<compile_context>
chip_gen: v5e
topology: v5e:2x2
jax: 0.10.0
libtpu: 0.0.40
codegen_flags: <defaults>
</compile_context>

<pallas_src>
import functools

import jax
import jax.numpy as jnp
from jax import lax
from jax.experimental import pallas as pl
from jax.experimental.pallas import tpu as pltpu

D_MODEL = 32
N_HEAD = 4
FF_HID = 64
EPS = 1e-5          # nn.LayerNorm default eps
NEG_INF = -1.0e9    # masked_fill value in the reference


def _round_up(x, m):
    return (x + m - 1) // m * m


# ----------------------------- packed parameter layout ---------------------------
def _param_layout(d_model, ff_hid):
    """Static row/col layout of the single packed parameter buffer (f32, 128-lane padded)."""
    D, F = d_model, ff_hid
    lanes = _round_up(max(3 * D, F, D, 1), 128)
    r = 0
    layout = {}
    layout["w_attn0"] = (r, r + D, 3 * D); r += D          # (D, 3D) fused QKV, block 1
    layout["w_attn1"] = (r, r + D, 3 * D); r += D          # (D, 3D) fused QKV, block 2
    layout["w1"] = (r, r + D, F); r += D                   # (D, F)
    layout["w2"] = (r, r + F, D); r += F                   # (F, D)
    vec_start = _round_up(r, 8)
    # vector block (one 8-aligned load covers every 1-row parameter):
    #   row 0: b_attn[0] (3D)    row 1: b_attn[1] (3D)
    #   row 2: ffn b1 (F)        row 3: ffn b2 (D)
    #   rows 4..9: LayerNorm g1, b1, g2, b2, g3, b3 (D each)
    layout["vec"] = (vec_start, vec_start + 16, lanes)
    total_rows = _round_up(vec_start + 16, 8)
    return layout, total_rows, lanes


def pack_params(params, d_model=D_MODEL, ff_hid=FF_HID):
    """Pack all 22 parameter tensors into one lane-padded f32 buffer (built once at init)."""
    layout, rows, lanes = _param_layout(d_model, ff_hid)
    D, F = d_model, ff_hid
    buf = jnp.zeros((rows, lanes), jnp.float32)
    r0, r1, c = layout["w_attn0"]; buf = buf.at[r0:r1, 0:c].set(params["w_attn"][0])
    r0, r1, c = layout["w_attn1"]; buf = buf.at[r0:r1, 0:c].set(params["w_attn"][1])
    r0, r1, c = layout["w1"];      buf = buf.at[r0:r1, 0:c].set(params["w1"])
    r0, r1, c = layout["w2"];      buf = buf.at[r0:r1, 0:c].set(params["w2"])
    v0, _, _ = layout["vec"]
    buf = buf.at[v0 + 0, 0:3 * D].set(params["b_attn"][0])
    buf = buf.at[v0 + 1, 0:3 * D].set(params["b_attn"][1])
    buf = buf.at[v0 + 2, 0:F].set(params["b1"][0])
    buf = buf.at[v0 + 3, 0:D].set(params["b2"][0])
    buf = buf.at[v0 + 4:v0 + 10, 0:D].set(params["ln"])
    return buf


# helpers for in-kernel index math (bitwise fast path when n is a power of two)
def _mod(v, n):
    if (n & (n - 1)) == 0:
        return lax.bitwise_and(v, n - 1)
    return lax.rem(v, n)


def _div(v, n):
    if (n & (n - 1)) == 0:
        return lax.shift_right_logical(v, n.bit_length() - 1)
    return v // n


# ------------------------------- Pallas kernel ---------------------------------
def decoder_layer_kernel(x_ref, mask_ref, p_ref, o_ref, *,
                         batch, seq, d_model, ff_hid, n_head):
    B, N, D, F = batch, seq, d_model, ff_hid
    M = B * N
    dh = D // n_head
    inv_scale = 1.0 / (float(dh) ** 0.5)          # multiply instead of divide

    layout, _, _ = _param_layout(D, F)

    def wslice(name):
        r0, r1, c = layout[name]
        return p_ref[r0:r1, 0:c]                  # static, sublane-aligned slice

    w_qkv = (wslice("w_attn0"), wslice("w_attn1"))
    w1 = wslice("w1")
    w2 = wslice("w2")
    v0, v1, _ = layout["vec"]
    vec = p_ref[v0:v1, :]                         # (16, lanes): all 1-row params in one load
    b_qkv = (vec[0:1, 0:3 * D], vec[1:2, 0:3 * D])
    b1 = vec[2:3, 0:F]
    b2 = vec[3:4, 0:D]
    ln = vec[4:10, 0:D]                           # rows: g1, b1, g2, b2, g3, b3

    # ---- block-diagonal additive mask bias, generated in-kernel from the (N, N) masks ----
    masks = mask_ref[...]                         # (2N, N): rows 0..N-1 tgt, N..2N-1 src
    # replication matrices (0/1): tiled[r, c] = mask[r % N, c % N]  — no gathers, no reshapes
    er = (lax.broadcasted_iota(jnp.int32, (M, N), 1)
          == _mod(lax.broadcasted_iota(jnp.int32, (M, N), 0), N)).astype(jnp.float32)
    ert = (lax.broadcasted_iota(jnp.int32, (N, M), 0)
           == _mod(lax.broadcasted_iota(jnp.int32, (N, M), 1), N)).astype(jnp.float32)
    same_batch = (_div(lax.broadcasted_iota(jnp.int32, (M, M), 0), N)
                  == _div(lax.broadcasted_iota(jnp.int32, (M, M), 1), N))

    def make_bias(mask_nn):
        allowed = (mask_nn != 0).astype(jnp.float32)                 # (N, N) of 0/1
        tiled = jnp.dot(er, jnp.dot(allowed, ert, preferred_element_type=jnp.float32),
                        preferred_element_type=jnp.float32)          # (M, M)
        # keep: 0.0 ; masked or cross-batch: -1e9 (exp underflows to exactly 0 in f32)
        return jnp.where(same_batch & (tiled > 0.5), 0.0, NEG_INF)

    tgt_bias = make_bias(masks[0:N, :])
    src_bias = make_bias(masks[N:2 * N, :])

    def layernorm(y, g, b):
        mu = jnp.mean(y, axis=-1, keepdims=True)
        var = jnp.mean((y - mu) ** 2, axis=-1, keepdims=True)        # biased, like nn.LayerNorm
        return g * (y - mu) * lax.rsqrt(var + EPS) + b

    def attention(y, w, b, bias):
        # Fused projection: one (M, D) @ (D, 3D) matmul instead of three (M, D) @ (D, D).
        qkv = jnp.dot(y, w, preferred_element_type=jnp.float32) + b   # (M, 3D)
        q = qkv[:, 0:D]
        kt = qkv[:, D:2 * D].T                    # ONE transpose per attention block
        v = qkv[:, 2 * D:3 * D]
        outs = []
        for h in range(n_head):                   # static unroll; each iter covers whole batch
            q_h = q[:, h * dh:(h + 1) * dh]
            kt_h = kt[h * dh:(h + 1) * dh, :]     # sublane-aligned (dh, M) slice
            v_h = v[:, h * dh:(h + 1) * dh]
            s = jnp.dot(q_h, kt_h, preferred_element_type=jnp.float32) * inv_scale
            s = s + bias
            s = s - jnp.max(s, axis=-1, keepdims=True)
            p = jnp.exp(s)
            p = p / jnp.sum(p, axis=-1, keepdims=True)   # exact softmax (no approx reciprocal)
            outs.append(jnp.dot(p, v_h, preferred_element_type=jnp.float32))
        return jnp.concatenate(outs, axis=-1)

    x = x_ref[...]                                # (M, D), M = B*N (batch folded into rows)

    # sub-layer 1: masked self-attention + residual + LN
    x = layernorm(x + attention(x, w_qkv[0], b_qkv[0], tgt_bias), ln[0:1, :], ln[1:2, :])
    # sub-layer 2: second self-attention (reference never uses `memory`) + residual + LN
    x = layernorm(x + attention(x, w_qkv[1], b_qkv[1], src_bias), ln[2:3, :], ln[3:4, :])
    # sub-layer 3: feed-forward + residual + LN
    hdn = jnp.maximum(jnp.dot(x, w1, preferred_element_type=jnp.float32) + b1, 0.0)
    ff = jnp.dot(hdn, w2, preferred_element_type=jnp.float32) + b2
    x = layernorm(x + ff, ln[4:5, :], ln[5:6, :])

    o_ref[...] = x.astype(o_ref.dtype)


# --------------------------------- wrapper --------------------------------------
def decoder_layer_pallas(x, memory, packed_params, tgt_mask, src_mask,
                         n_head=N_HEAD, ff_hid=FF_HID):
    # `memory` is accepted but never used by the reference module's SelfAttention.
    del memory
    B, N, D = x.shape
    M = B * N
    x2d = x.reshape(M, D)
    # Only the tiny (N, N) masks cross the kernel boundary (stacked to one 2-D operand);
    # the (M, M) block-diagonal bias is generated inside the kernel.
    mask2d = jnp.concatenate([tgt_mask, src_mask], axis=0).astype(jnp.float32)   # (2N, N)

    kernel = functools.partial(decoder_layer_kernel, batch=B, seq=N,
                               d_model=D, ff_hid=ff_hid, n_head=n_head)
    out2d = pl.pallas_call(
        kernel,
        out_shape=jax.ShapeDtypeStruct((M, D), jnp.float32),
        # Single invocation (no grid): every operand is a whole block resident in VMEM,
        # so there is no per-step pipeline overhead and params are fetched exactly once.
        # TODO(synk): at large M, grid over row-blocks with dimension_semantics=("parallel",)
        # to use both v7x TensorCores and to keep the (M, M) score tiles within 64 MiB VMEM.
        compiler_params=pltpu.CompilerParams(vmem_limit_bytes=32 * 1024 * 1024),
    )(x2d, mask2d, packed_params)
    return out2d.reshape(B, N, D)


# --------------------------- deterministic param init ---------------------------
def init_params(key, d_model, n_head, ff_hid):
    D, F = d_model, ff_hid
    ks = jax.random.split(key, 16)

    def w(k, shape):
        return 0.05 * jax.random.normal(k, shape, dtype=jnp.float32)

    # Fused QKV weights, stored pre-transposed for x @ W; columns = [q | k | v].
    w_attn = jnp.stack([
        jnp.concatenate([w(ks[0], (D, D)), w(ks[1], (D, D)), w(ks[2], (D, D))], axis=1),
        jnp.concatenate([w(ks[3], (D, D)), w(ks[4], (D, D)), w(ks[5], (D, D))], axis=1),
    ], axis=0)                                              # (2, D, 3D)
    b_attn = jnp.stack([
        jnp.concatenate([w(ks[6], (D,)), w(ks[7], (D,)), w(ks[8], (D,))], axis=0),
        jnp.concatenate([w(ks[9], (D,)), w(ks[10], (D,)), w(ks[11], (D,))], axis=0),
    ], axis=0)                                              # (2, 3D)

    return {
        "w_attn": w_attn, "b_attn": b_attn,
        "w1": w(ks[12], (D, F)), "b1": w(ks[13], (1, F)),
        "w2": w(ks[14], (F, D)), "b2": w(ks[15], (1, D)),
        # LayerNorm affine params (PyTorch default: gamma=1, beta=0): rows g1,b1,g2,b2,g3,b3
        "ln": jnp.concatenate(
            [jnp.ones((1, D), jnp.float32), jnp.zeros((1, D), jnp.float32)] * 3, axis=0),
    }


# --------------------- pure-JAX reference (PyTorch semantics) --------------------
def jax_reference(x, params, tgt_mask, src_mask, n_head):
    B, N, D = x.shape
    dh = D // n_head
    scale = float(dh) ** 0.5
    ln = params["ln"]

    def layernorm(y, g, b):
        mu = jnp.mean(y, axis=-1, keepdims=True)
        var = jnp.mean((y - mu) ** 2, axis=-1, keepdims=True)
        return g * (y - mu) / jnp.sqrt(var + EPS) + b

    def self_attention(y, w_qkv, b_qkv, mask):
        qkv = y @ w_qkv + b_qkv
        q, k, v = qkv[..., :D], qkv[..., D:2 * D], qkv[..., 2 * D:]
        q = q.reshape(B, N, n_head, dh).transpose(0, 2, 1, 3)
        k = k.reshape(B, N, n_head, dh).transpose(0, 2, 1, 3)
        v = v.reshape(B, N, n_head, dh).transpose(0, 2, 1, 3)
        attn = jnp.einsum('bhqd,bhkd->bhqk', q, k) / scale
        attn = jnp.where(mask == 0, NEG_INF, attn)          # masked_fill(mask == 0, -1e9)
        attn = jax.nn.softmax(attn, axis=-1)
        out = jnp.einsum('bhqk,bhkd->bhqd', attn, v)
        return out.transpose(0, 2, 1, 3).reshape(B, N, D)

    x = layernorm(x + self_attention(x, params["w_attn"][0], params["b_attn"][0], tgt_mask),
                  ln[0], ln[1])
    x = layernorm(x + self_attention(x, params["w_attn"][1], params["b_attn"][1], src_mask),
                  ln[2], ln[3])
    h = jnp.maximum(x @ params["w1"] + params["b1"], 0.0)
    f = h @ params["w2"] + params["b2"]
    x = layernorm(x + f, ln[4], ln[5])
    return x


# ------------------------------------ main ---------------------------------------
if __name__ == "__main__":
    B, N = 2, 8
    key = jax.random.PRNGKey(0)
    k_x, k_mem, k_p = jax.random.split(key, 3)

    x = jax.random.normal(k_x, (B, N, D_MODEL), dtype=jnp.float32)
    memory = jax.random.normal(k_mem, (B, N, D_MODEL), dtype=jnp.float32)  # unused (as in reference)
    params = init_params(k_p, D_MODEL, N_HEAD, FF_HID)
    packed = pack_params(params)              # single lane-padded parameter operand, built once

    # causal target mask (lower triangular), full source mask
    tgt_mask = jnp.tril(jnp.ones((N, N), dtype=jnp.float32))
    src_mask = jnp.ones((N, N), dtype=jnp.float32)

    out = decoder_layer_pallas(x, memory, packed, tgt_mask, src_mask)
    out = jax.block_until_ready(out)

    ref = jax_reference(x, params, tgt_mask, src_mask, N_HEAD)
    ref = jax.block_until_ready(ref)

    assert out.shape == (B, N, D_MODEL)
    # Exact softmax (plain divide) restores near-parity with the f32 reference.
    assert jnp.allclose(out, ref, rtol=1e-4, atol=1e-4), "Pallas output mismatch vs reference"
    print("KERNEL_OK")
</pallas_src>

<mosaic_0001>
module attributes {stable_mosaic.version = 11 : i64} {
  func.func @decoder_layer_kernel(%arg0: memref<16x32xf32, #tpu.memory_space<vmem>>, %arg1: memref<16x8xf32, #tpu.memory_space<vmem>>, %arg2: memref<176x128xf32, #tpu.memory_space<vmem>>, %arg3: memref<16x32xf32, #tpu.memory_space<vmem>>) attributes {dimension_semantics = [], scalar_prefetch = 0 : i64, scratch_operands = 0 : i64, tpu.core_type = #tpu.core_type<tc>} {
    %c0 = arith.constant 0 : index
    %c0_0 = arith.constant 0 : index
    %0 = vector.load %arg2[%c0, %c0_0] : memref<176x128xf32, #tpu.memory_space<vmem>>, vector<32x96xf32>
    %c32 = arith.constant 32 : index
    %c0_1 = arith.constant 0 : index
    %1 = vector.load %arg2[%c32, %c0_1] : memref<176x128xf32, #tpu.memory_space<vmem>>, vector<32x96xf32>
    %c64 = arith.constant 64 : index
    %c0_2 = arith.constant 0 : index
    %2 = vector.load %arg2[%c64, %c0_2] : memref<176x128xf32, #tpu.memory_space<vmem>>, vector<32x64xf32>
    %c96 = arith.constant 96 : index
    %c0_3 = arith.constant 0 : index
    %3 = vector.load %arg2[%c96, %c0_3] : memref<176x128xf32, #tpu.memory_space<vmem>>, vector<64x32xf32>
    %c160 = arith.constant 160 : index
    %c0_4 = arith.constant 0 : index
    %4 = vector.load %arg2[%c160, %c0_4] : memref<176x128xf32, #tpu.memory_space<vmem>>, vector<16x128xf32>
    %5 = vector.extract_strided_slice %4 {offsets = [0, 0], sizes = [1, 96], strides = [1, 1]} : vector<16x128xf32> to vector<1x96xf32>
    %6 = vector.extract_strided_slice %4 {offsets = [1, 0], sizes = [1, 96], strides = [1, 1]} : vector<16x128xf32> to vector<1x96xf32>
    %7 = vector.extract_strided_slice %4 {offsets = [2, 0], sizes = [1, 64], strides = [1, 1]} : vector<16x128xf32> to vector<1x64xf32>
    %8 = vector.extract_strided_slice %4 {offsets = [3, 0], sizes = [1, 32], strides = [1, 1]} : vector<16x128xf32> to vector<1x32xf32>
    %9 = vector.extract_strided_slice %4 {offsets = [4, 0], sizes = [6, 32], strides = [1, 1]} : vector<16x128xf32> to vector<6x32xf32>
    %c0_5 = arith.constant 0 : index
    %c0_6 = arith.constant 0 : index
    %10 = vector.load %arg1[%c0_5, %c0_6] : memref<16x8xf32, #tpu.memory_space<vmem>>, vector<16x8xf32>
    %11 = tpu.iota {dimensions = array<i32: 1>} : vector<16x8xi32>
    %12 = tpu.iota {dimensions = array<i32: 0>} : vector<16x8xi32>
    %c7_i32 = arith.constant 7 : i32
    %13 = vector.broadcast %c7_i32 : i32 to vector<16x8xi32>
    %14 = arith.andi %12, %13 : vector<16x8xi32>
    %15 = arith.cmpi eq, %11, %14 : vector<16x8xi32>
    %16 = arith.extui %15 : vector<16x8xi1> to vector<16x8xi32>
    %17 = arith.sitofp %16 : vector<16x8xi32> to vector<16x8xf32>
    %18 = tpu.iota {dimensions = array<i32: 0>} : vector<8x16xi32>
    %19 = tpu.iota {dimensions = array<i32: 1>} : vector<8x16xi32>
    %c7_i32_7 = arith.constant 7 : i32
    %20 = vector.broadcast %c7_i32_7 : i32 to vector<8x16xi32>
    %21 = arith.andi %19, %20 : vector<8x16xi32>
    %22 = arith.cmpi eq, %18, %21 : vector<8x16xi32>
    %23 = arith.extui %22 : vector<8x16xi1> to vector<8x16xi32>
    %24 = arith.sitofp %23 : vector<8x16xi32> to vector<8x16xf32>
    %25 = tpu.iota {dimensions = array<i32: 0>} : vector<16x16xi32>
    %c3_i32 = arith.constant 3 : i32
    %26 = vector.broadcast %c3_i32 : i32 to vector<16x16xi32>
    %27 = arith.shrui %25, %26 : vector<16x16xi32>
    %28 = tpu.iota {dimensions = array<i32: 1>} : vector<16x16xi32>
    %c3_i32_8 = arith.constant 3 : i32
    %29 = vector.broadcast %c3_i32_8 : i32 to vector<16x16xi32>
    %30 = arith.shrui %28, %29 : vector<16x16xi32>
    %31 = arith.cmpi eq, %27, %30 : vector<16x16xi32>
    %32 = vector.extract_strided_slice %10 {offsets = [0, 0], sizes = [8, 8], strides = [1, 1]} : vector<16x8xf32> to vector<8x8xf32>
    %cst = arith.constant 0.000000e+00 : f32
    %33 = vector.broadcast %cst : f32 to vector<8x8xf32>
    %34 = arith.cmpf one, %32, %33 : vector<8x8xf32>
    %35 = arith.extui %34 : vector<8x8xi1> to vector<8x8xi32>
    %36 = arith.sitofp %35 : vector<8x8xi32> to vector<8x8xf32>
    %cst_9 = arith.constant dense<0.000000e+00> : vector<8x16xf32>
    %37 = tpu.matmul %36, %24, %cst_9 {dimension_numbers = #tpu.dot_dimension_numbers<[1], [0], [0], [1], [0, 0, 1, 1], [], []>} : vector<8x8xf32>, vector<8x16xf32>, vector<8x16xf32> -> vector<8x16xf32>
    %cst_10 = arith.constant dense<0.000000e+00> : vector<16x16xf32>
    %38 = tpu.matmul %17, %37, %cst_10 {dimension_numbers = #tpu.dot_dimension_numbers<[1], [0], [0], [1], [0, 0, 1, 1], [], []>} : vector<16x8xf32>, vector<8x16xf32>, vector<16x16xf32> -> vector<16x16xf32>
    %cst_11 = arith.constant 5.000000e-01 : f32
    %39 = vector.broadcast %cst_11 : f32 to vector<16x16xf32>
    %40 = arith.cmpf ogt, %38, %39 : vector<16x16xf32>
    %41 = arith.andi %31, %40 : vector<16x16xi1>
    %cst_12 = arith.constant 0.000000e+00 : f32
    %cst_13 = arith.constant -1.000000e+09 : f32
    %42 = vector.broadcast %cst_12 : f32 to vector<16x16xf32>
    %43 = vector.broadcast %cst_13 : f32 to vector<16x16xf32>
    %44 = arith.select %41, %42, %43 : vector<16x16xi1>, vector<16x16xf32>
    %45 = vector.extract_strided_slice %10 {offsets = [8, 0], sizes = [8, 8], strides = [1, 1]} : vector<16x8xf32> to vector<8x8xf32>
    %cst_14 = arith.constant 0.000000e+00 : f32
    %46 = vector.broadcast %cst_14 : f32 to vector<8x8xf32>
    %47 = arith.cmpf one, %45, %46 : vector<8x8xf32>
    %48 = arith.extui %47 : vector<8x8xi1> to vector<8x8xi32>
    %49 = arith.sitofp %48 : vector<8x8xi32> to vector<8x8xf32>
    %cst_15 = arith.constant dense<0.000000e+00> : vector<8x16xf32>
    %50 = tpu.matmul %49, %24, %cst_15 {dimension_numbers = #tpu.dot_dimension_numbers<[1], [0], [0], [1], [0, 0, 1, 1], [], []>} : vector<8x8xf32>, vector<8x16xf32>, vector<8x16xf32> -> vector<8x16xf32>
    %cst_16 = arith.constant dense<0.000000e+00> : vector<16x16xf32>
    %51 = tpu.matmul %17, %50, %cst_16 {dimension_numbers = #tpu.dot_dimension_numbers<[1], [0], [0], [1], [0, 0, 1, 1], [], []>} : vector<16x8xf32>, vector<8x16xf32>, vector<16x16xf32> -> vector<16x16xf32>
    %cst_17 = arith.constant 5.000000e-01 : f32
    %52 = vector.broadcast %cst_17 : f32 to vector<16x16xf32>
    %53 = arith.cmpf ogt, %51, %52 : vector<16x16xf32>
    %54 = arith.andi %31, %53 : vector<16x16xi1>
    %cst_18 = arith.constant 0.000000e+00 : f32
    %cst_19 = arith.constant -1.000000e+09 : f32
    %55 = vector.broadcast %cst_18 : f32 to vector<16x16xf32>
    %56 = vector.broadcast %cst_19 : f32 to vector<16x16xf32>
    %57 = arith.select %54, %55, %56 : vector<16x16xi1>, vector<16x16xf32>
    %c0_20 = arith.constant 0 : index
    %c0_21 = arith.constant 0 : index
    %58 = vector.load %arg0[%c0_20, %c0_21] : memref<16x32xf32, #tpu.memory_space<vmem>>, vector<16x32xf32>
    %cst_22 = arith.constant dense<0.000000e+00> : vector<16x96xf32>
    %59 = tpu.matmul %58, %0, %cst_22 {dimension_numbers = #tpu.dot_dimension_numbers<[1], [0], [0], [1], [0, 0, 1, 1], [], []>} : vector<16x32xf32>, vector<32x96xf32>, vector<16x96xf32> -> vector<16x96xf32>
    %60 = vector.broadcast %5 : vector<1x96xf32> to vector<16x96xf32>
    %61 = arith.addf %59, %60 : vector<16x96xf32>
    %62 = vector.extract_strided_slice %61 {offsets = [0, 0], sizes = [16, 32], strides = [1, 1]} : vector<16x96xf32> to vector<16x32xf32>
    %63 = vector.extract_strided_slice %61 {offsets = [0, 32], sizes = [16, 32], strides = [1, 1]} : vector<16x96xf32> to vector<16x32xf32>
    %64 = tpu.transpose %63, [1, 0] : vector<16x32xf32> -> vector<32x16xf32>
    %65 = vector.extract_strided_slice %61 {offsets = [0, 64], sizes = [16, 32], strides = [1, 1]} : vector<16x96xf32> to vector<16x32xf32>
    %66 = vector.extract_strided_slice %62 {offsets = [0, 0], sizes = [16, 8], strides = [1, 1]} : vector<16x32xf32> to vector<16x8xf32>
    %67 = vector.extract_strided_slice %64 {offsets = [0, 0], sizes = [8, 16], strides = [1, 1]} : vector<32x16xf32> to vector<8x16xf32>
    %68 = vector.extract_strided_slice %65 {offsets = [0, 0], sizes = [16, 8], strides = [1, 1]} : vector<16x32xf32> to vector<16x8xf32>
    %cst_23 = arith.constant dense<0.000000e+00> : vector<16x16xf32>
    %69 = tpu.matmul %66, %67, %cst_23 {dimension_numbers = #tpu.dot_dimension_numbers<[1], [0], [0], [1], [0, 0, 1, 1], [], []>} : vector<16x8xf32>, vector<8x16xf32>, vector<16x16xf32> -> vector<16x16xf32>
    %cst_24 = arith.constant 0.353553385 : f32
    %70 = vector.broadcast %cst_24 : f32 to vector<16x16xf32>
    %71 = arith.mulf %69, %70 : vector<16x16xf32>
    %72 = arith.addf %71, %44 : vector<16x16xf32>
    %cst_25 = arith.constant dense<0xFF800000> : vector<16xf32>
    %73 = vector.multi_reduction <maximumf>, %72, %cst_25 [1] : vector<16x16xf32> to vector<16xf32>
    %74 = vector.shape_cast %73 : vector<16xf32> to vector<16x1xf32>
    %75 = vector.broadcast %74 : vector<16x1xf32> to vector<16x16xf32>
    %76 = arith.subf %72, %75 : vector<16x16xf32>
    %77 = math.exp %76 : vector<16x16xf32>
    %cst_26 = arith.constant dense<0.000000e+00> : vector<16xf32>
    %78 = vector.multi_reduction <add>, %77, %cst_26 [1] : vector<16x16xf32> to vector<16xf32>
    %79 = vector.shape_cast %78 : vector<16xf32> to vector<16x1xf32>
    %80 = vector.broadcast %79 : vector<16x1xf32> to vector<16x16xf32>
    %81 = arith.divf %77, %80 : vector<16x16xf32>
    %cst_27 = arith.constant dense<0.000000e+00> : vector<16x8xf32>
    %82 = tpu.matmul %81, %68, %cst_27 {dimension_numbers = #tpu.dot_dimension_numbers<[1], [0], [0], [1], [0, 0, 1, 1], [], []>} : vector<16x16xf32>, vector<16x8xf32>, vector<16x8xf32> -> vector<16x8xf32>
    %83 = vector.extract_strided_slice %62 {offsets = [0, 8], sizes = [16, 8], strides = [1, 1]} : vector<16x32xf32> to vector<16x8xf32>
    %84 = vector.extract_strided_slice %64 {offsets = [8, 0], sizes = [8, 16], strides = [1, 1]} : vector<32x16xf32> to vector<8x16xf32>
    %85 = vector.extract_strided_slice %65 {offsets = [0, 8], sizes = [16, 8], strides = [1, 1]} : vector<16x32xf32> to vector<16x8xf32>
    %cst_28 = arith.constant dense<0.000000e+00> : vector<16x16xf32>
    %86 = tpu.matmul %83, %84, %cst_28 {dimension_numbers = #tpu.dot_dimension_numbers<[1], [0], [0], [1], [0, 0, 1, 1], [], []>} : vector<16x8xf32>, vector<8x16xf32>, vector<16x16xf32> -> vector<16x16xf32>
    %cst_29 = arith.constant 0.353553385 : f32
    %87 = vector.broadcast %cst_29 : f32 to vector<16x16xf32>
    %88 = arith.mulf %86, %87 : vector<16x16xf32>
    %89 = arith.addf %88, %44 : vector<16x16xf32>
    %cst_30 = arith.constant dense<0xFF800000> : vector<16xf32>
    %90 = vector.multi_reduction <maximumf>, %89, %cst_30 [1] : vector<16x16xf32> to vector<16xf32>
    %91 = vector.shape_cast %90 : vector<16xf32> to vector<16x1xf32>
    %92 = vector.broadcast %91 : vector<16x1xf32> to vector<16x16xf32>
    %93 = arith.subf %89, %92 : vector<16x16xf32>
    %94 = math.exp %93 : vector<16x16xf32>
    %cst_31 = arith.constant dense<0.000000e+00> : vector<16xf32>
    %95 = vector.multi_reduction <add>, %94, %cst_31 [1] : vector<16x16xf32> to vector<16xf32>
    %96 = vector.shape_cast %95 : vector<16xf32> to vector<16x1xf32>
    %97 = vector.broadcast %96 : vector<16x1xf32> to vector<16x16xf32>
    %98 = arith.divf %94, %97 : vector<16x16xf32>
    %cst_32 = arith.constant dense<0.000000e+00> : vector<16x8xf32>
    %99 = tpu.matmul %98, %85, %cst_32 {dimension_numbers = #tpu.dot_dimension_numbers<[1], [0], [0], [1], [0, 0, 1, 1], [], []>} : vector<16x16xf32>, vector<16x8xf32>, vector<16x8xf32> -> vector<16x8xf32>
    %100 = vector.extract_strided_slice %62 {offsets = [0, 16], sizes = [16, 8], strides = [1, 1]} : vector<16x32xf32> to vector<16x8xf32>
    %101 = vector.extract_strided_slice %64 {offsets = [16, 0], sizes = [8, 16], strides = [1, 1]} : vector<32x16xf32> to vector<8x16xf32>
    %102 = vector.extract_strided_slice %65 {offsets = [0, 16], sizes = [16, 8], strides = [1, 1]} : vector<16x32xf32> to vector<16x8xf32>
    %cst_33 = arith.constant dense<0.000000e+00> : vector<16x16xf32>
    %103 = tpu.matmul %100, %101, %cst_33 {dimension_numbers = #tpu.dot_dimension_numbers<[1], [0], [0], [1], [0, 0, 1, 1], [], []>} : vector<16x8xf32>, vector<8x16xf32>, vector<16x16xf32> -> vector<16x16xf32>
    %cst_34 = arith.constant 0.353553385 : f32
    %104 = vector.broadcast %cst_34 : f32 to vector<16x16xf32>
    %105 = arith.mulf %103, %104 : vector<16x16xf32>
    %106 = arith.addf %105, %44 : vector<16x16xf32>
    %cst_35 = arith.constant dense<0xFF800000> : vector<16xf32>
    %107 = vector.multi_reduction <maximumf>, %106, %cst_35 [1] : vector<16x16xf32> to vector<16xf32>
    %108 = vector.shape_cast %107 : vector<16xf32> to vector<16x1xf32>
    %109 = vector.broadcast %108 : vector<16x1xf32> to vector<16x16xf32>
    %110 = arith.subf %106, %109 : vector<16x16xf32>
    %111 = math.exp %110 : vector<16x16xf32>
    %cst_36 = arith.constant dense<0.000000e+00> : vector<16xf32>
    %112 = vector.multi_reduction <add>, %111, %cst_36 [1] : vector<16x16xf32> to vector<16xf32>
    %113 = vector.shape_cast %112 : vector<16xf32> to vector<16x1xf32>
    %114 = vector.broadcast %113 : vector<16x1xf32> to vector<16x16xf32>
    %115 = arith.divf %111, %114 : vector<16x16xf32>
    %cst_37 = arith.constant dense<0.000000e+00> : vector<16x8xf32>
    %116 = tpu.matmul %115, %102, %cst_37 {dimension_numbers = #tpu.dot_dimension_numbers<[1], [0], [0], [1], [0, 0, 1, 1], [], []>} : vector<16x16xf32>, vector<16x8xf32>, vector<16x8xf32> -> vector<16x8xf32>
    %117 = vector.extract_strided_slice %62 {offsets = [0, 24], sizes = [16, 8], strides = [1, 1]} : vector<16x32xf32> to vector<16x8xf32>
    %118 = vector.extract_strided_slice %64 {offsets = [24, 0], sizes = [8, 16], strides = [1, 1]} : vector<32x16xf32> to vector<8x16xf32>
    %119 = vector.extract_strided_slice %65 {offsets = [0, 24], sizes = [16, 8], strides = [1, 1]} : vector<16x32xf32> to vector<16x8xf32>
    %cst_38 = arith.constant dense<0.000000e+00> : vector<16x16xf32>
    %120 = tpu.matmul %117, %118, %cst_38 {dimension_numbers = #tpu.dot_dimension_numbers<[1], [0], [0], [1], [0, 0, 1, 1], [], []>} : vector<16x8xf32>, vector<8x16xf32>, vector<16x16xf32> -> vector<16x16xf32>
    %cst_39 = arith.constant 0.353553385 : f32
    %121 = vector.broadcast %cst_39 : f32 to vector<16x16xf32>
    %122 = arith.mulf %120, %121 : vector<16x16xf32>
    %123 = arith.addf %122, %44 : vector<16x16xf32>
    %cst_40 = arith.constant dense<0xFF800000> : vector<16xf32>
    %124 = vector.multi_reduction <maximumf>, %123, %cst_40 [1] : vector<16x16xf32> to vector<16xf32>
    %125 = vector.shape_cast %124 : vector<16xf32> to vector<16x1xf32>
    %126 = vector.broadcast %125 : vector<16x1xf32> to vector<16x16xf32>
    %127 = arith.subf %123, %126 : vector<16x16xf32>
    %128 = math.exp %127 : vector<16x16xf32>
    %cst_41 = arith.constant dense<0.000000e+00> : vector<16xf32>
    %129 = vector.multi_reduction <add>, %128, %cst_41 [1] : vector<16x16xf32> to vector<16xf32>
    %130 = vector.shape_cast %129 : vector<16xf32> to vector<16x1xf32>
    %131 = vector.broadcast %130 : vector<16x1xf32> to vector<16x16xf32>
    %132 = arith.divf %128, %131 : vector<16x16xf32>
    %cst_42 = arith.constant dense<0.000000e+00> : vector<16x8xf32>
    %133 = tpu.matmul %132, %119, %cst_42 {dimension_numbers = #tpu.dot_dimension_numbers<[1], [0], [0], [1], [0, 0, 1, 1], [], []>} : vector<16x16xf32>, vector<16x8xf32>, vector<16x8xf32> -> vector<16x8xf32>
    %134 = tpu.concatenate %82, %99, %116, %133 in 1 : vector<16x8xf32>, vector<16x8xf32>, vector<16x8xf32>, vector<16x8xf32> -> vector<16x32xf32>
    %135 = arith.addf %58, %134 : vector<16x32xf32>
    %136 = vector.extract_strided_slice %9 {offsets = [0, 0], sizes = [1, 32], strides = [1, 1]} : vector<6x32xf32> to vector<1x32xf32>
    %137 = vector.extract_strided_slice %9 {offsets = [1, 0], sizes = [1, 32], strides = [1, 1]} : vector<6x32xf32> to vector<1x32xf32>
    %cst_43 = arith.constant dense<0.000000e+00> : vector<16xf32>
    %138 = vector.multi_reduction <add>, %135, %cst_43 [1] : vector<16x32xf32> to vector<16xf32>
    %139 = vector.shape_cast %138 : vector<16xf32> to vector<16x1xf32>
    %cst_44 = arith.constant 3.200000e+01 : f32
    %140 = vector.broadcast %cst_44 : f32 to vector<16x1xf32>
    %141 = arith.divf %139, %140 : vector<16x1xf32>
    %142 = vector.broadcast %141 : vector<16x1xf32> to vector<16x32xf32>
    %143 = arith.subf %135, %142 : vector<16x32xf32>
    %144 = arith.mulf %143, %143 : vector<16x32xf32>
    %cst_45 = arith.constant dense<0.000000e+00> : vector<16xf32>
    %145 = vector.multi_reduction <add>, %144, %cst_45 [1] : vector<16x32xf32> to vector<16xf32>
    %146 = vector.shape_cast %145 : vector<16xf32> to vector<16x1xf32>
    %cst_46 = arith.constant 3.200000e+01 : f32
    %147 = vector.broadcast %cst_46 : f32 to vector<16x1xf32>
    %148 = arith.divf %146, %147 : vector<16x1xf32>
    %149 = vector.broadcast %141 : vector<16x1xf32> to vector<16x32xf32>
    %150 = arith.subf %135, %149 : vector<16x32xf32>
    %151 = vector.broadcast %136 : vector<1x32xf32> to vector<16x32xf32>
    %152 = arith.mulf %151, %150 : vector<16x32xf32>
    %cst_47 = arith.constant 9.99999974E-6 : f32
    %153 = vector.broadcast %cst_47 : f32 to vector<16x1xf32>
    %154 = arith.addf %148, %153 : vector<16x1xf32>
    %155 = math.rsqrt %154 : vector<16x1xf32>
    %156 = vector.broadcast %155 : vector<16x1xf32> to vector<16x32xf32>
    %157 = arith.mulf %152, %156 : vector<16x32xf32>
    %158 = vector.broadcast %137 : vector<1x32xf32> to vector<16x32xf32>
    %159 = arith.addf %157, %158 : vector<16x32xf32>
    %cst_48 = arith.constant dense<0.000000e+00> : vector<16x96xf32>
    %160 = tpu.matmul %159, %1, %cst_48 {dimension_numbers = #tpu.dot_dimension_numbers<[1], [0], [0], [1], [0, 0, 1, 1], [], []>} : vector<16x32xf32>, vector<32x96xf32>, vector<16x96xf32> -> vector<16x96xf32>
    %161 = vector.broadcast %6 : vector<1x96xf32> to vector<16x96xf32>
    %162 = arith.addf %160, %161 : vector<16x96xf32>
    %163 = vector.extract_strided_slice %162 {offsets = [0, 0], sizes = [16, 32], strides = [1, 1]} : vector<16x96xf32> to vector<16x32xf32>
    %164 = vector.extract_strided_slice %162 {offsets = [0, 32], sizes = [16, 32], strides = [1, 1]} : vector<16x96xf32> to vector<16x32xf32>
    %165 = tpu.transpose %164, [1, 0] : vector<16x32xf32> -> vector<32x16xf32>
    %166 = vector.extract_strided_slice %162 {offsets = [0, 64], sizes = [16, 32], strides = [1, 1]} : vector<16x96xf32> to vector<16x32xf32>
    %167 = vector.extract_strided_slice %163 {offsets = [0, 0], sizes = [16, 8], strides = [1, 1]} : vector<16x32xf32> to vector<16x8xf32>
    %168 = vector.extract_strided_slice %165 {offsets = [0, 0], sizes = [8, 16], strides = [1, 1]} : vector<32x16xf32> to vector<8x16xf32>
    %169 = vector.extract_strided_slice %166 {offsets = [0, 0], sizes = [16, 8], strides = [1, 1]} : vector<16x32xf32> to vector<16x8xf32>
    %cst_49 = arith.constant dense<0.000000e+00> : vector<16x16xf32>
    %170 = tpu.matmul %167, %168, %cst_49 {dimension_numbers = #tpu.dot_dimension_numbers<[1], [0], [0], [1], [0, 0, 1, 1], [], []>} : vector<16x8xf32>, vector<8x16xf32>, vector<16x16xf32> -> vector<16x16xf32>
    %cst_50 = arith.constant 0.353553385 : f32
    %171 = vector.broadcast %cst_50 : f32 to vector<16x16xf32>
    %172 = arith.mulf %170, %171 : vector<16x16xf32>
    %173 = arith.addf %172, %57 : vector<16x16xf32>
    %cst_51 = arith.constant dense<0xFF800000> : vector<16xf32>
    %174 = vector.multi_reduction <maximumf>, %173, %cst_51 [1] : vector<16x16xf32> to vector<16xf32>
    %175 = vector.shape_cast %174 : vector<16xf32> to vector<16x1xf32>
    %176 = vector.broadcast %175 : vector<16x1xf32> to vector<16x16xf32>
    %177 = arith.subf %173, %176 : vector<16x16xf32>
    %178 = math.exp %177 : vector<16x16xf32>
    %cst_52 = arith.constant dense<0.000000e+00> : vector<16xf32>
    %179 = vector.multi_reduction <add>, %178, %cst_52 [1] : vector<16x16xf32> to vector<16xf32>
    %180 = vector.shape_cast %179 : vector<16xf32> to vector<16x1xf32>
    %181 = vector.broadcast %180 : vector<16x1xf32> to vector<16x16xf32>
    %182 = arith.divf %178, %181 : vector<16x16xf32>
    %cst_53 = arith.constant dense<0.000000e+00> : vector<16x8xf32>
    %183 = tpu.matmul %182, %169, %cst_53 {dimension_numbers = #tpu.dot_dimension_numbers<[1], [0], [0], [1], [0, 0, 1, 1], [], []>} : vector<16x16xf32>, vector<16x8xf32>, vector<16x8xf32> -> vector<16x8xf32>
    %184 = vector.extract_strided_slice %163 {offsets = [0, 8], sizes = [16, 8], strides = [1, 1]} : vector<16x32xf32> to vector<16x8xf32>
    %185 = vector.extract_strided_slice %165 {offsets = [8, 0], sizes = [8, 16], strides = [1, 1]} : vector<32x16xf32> to vector<8x16xf32>
    %186 = vector.extract_strided_slice %166 {offsets = [0, 8], sizes = [16, 8], strides = [1, 1]} : vector<16x32xf32> to vector<16x8xf32>
    %cst_54 = arith.constant dense<0.000000e+00> : vector<16x16xf32>
    %187 = tpu.matmul %184, %185, %cst_54 {dimension_numbers = #tpu.dot_dimension_numbers<[1], [0], [0], [1], [0, 0, 1, 1], [], []>} : vector<16x8xf32>, vector<8x16xf32>, vector<16x16xf32> -> vector<16x16xf32>
    %cst_55 = arith.constant 0.353553385 : f32
    %188 = vector.broadcast %cst_55 : f32 to vector<16x16xf32>
    %189 = arith.mulf %187, %188 : vector<16x16xf32>
    %190 = arith.addf %189, %57 : vector<16x16xf32>
    %cst_56 = arith.constant dense<0xFF800000> : vector<16xf32>
    %191 = vector.multi_reduction <maximumf>, %190, %cst_56 [1] : vector<16x16xf32> to vector<16xf32>
    %192 = vector.shape_cast %191 : vector<16xf32> to vector<16x1xf32>
    %193 = vector.broadcast %192 : vector<16x1xf32> to vector<16x16xf32>
    %194 = arith.subf %190, %193 : vector<16x16xf32>
    %195 = math.exp %194 : vector<16x16xf32>
    %cst_57 = arith.constant dense<0.000000e+00> : vector<16xf32>
    %196 = vector.multi_reduction <add>, %195, %cst_57 [1] : vector<16x16xf32> to vector<16xf32>
    %197 = vector.shape_cast %196 : vector<16xf32> to vector<16x1xf32>
    %198 = vector.broadcast %197 : vector<16x1xf32> to vector<16x16xf32>
    %199 = arith.divf %195, %198 : vector<16x16xf32>
    %cst_58 = arith.constant dense<0.000000e+00> : vector<16x8xf32>
    %200 = tpu.matmul %199, %186, %cst_58 {dimension_numbers = #tpu.dot_dimension_numbers<[1], [0], [0], [1], [0, 0, 1, 1], [], []>} : vector<16x16xf32>, vector<16x8xf32>, vector<16x8xf32> -> vector<16x8xf32>
    %201 = vector.extract_strided_slice %163 {offsets = [0, 16], sizes = [16, 8], strides = [1, 1]} : vector<16x32xf32> to vector<16x8xf32>
    %202 = vector.extract_strided_slice %165 {offsets = [16, 0], sizes = [8, 16], strides = [1, 1]} : vector<32x16xf32> to vector<8x16xf32>
    %203 = vector.extract_strided_slice %166 {offsets = [0, 16], sizes = [16, 8], strides = [1, 1]} : vector<16x32xf32> to vector<16x8xf32>
    %cst_59 = arith.constant dense<0.000000e+00> : vector<16x16xf32>
    %204 = tpu.matmul %201, %202, %cst_59 {dimension_numbers = #tpu.dot_dimension_numbers<[1], [0], [0], [1], [0, 0, 1, 1], [], []>} : vector<16x8xf32>, vector<8x16xf32>, vector<16x16xf32> -> vector<16x16xf32>
    %cst_60 = arith.constant 0.353553385 : f32
    %205 = vector.broadcast %cst_60 : f32 to vector<16x16xf32>
    %206 = arith.mulf %204, %205 : vector<16x16xf32>
    %207 = arith.addf %206, %57 : vector<16x16xf32>
    %cst_61 = arith.constant dense<0xFF800000> : vector<16xf32>
    %208 = vector.multi_reduction <maximumf>, %207, %cst_61 [1] : vector<16x16xf32> to vector<16xf32>
    %209 = vector.shape_cast %208 : vector<16xf32> to vector<16x1xf32>
    %210 = vector.broadcast %209 : vector<16x1xf32> to vector<16x16xf32>
    %211 = arith.subf %207, %210 : vector<16x16xf32>
    %212 = math.exp %211 : vector<16x16xf32>
    %cst_62 = arith.constant dense<0.000000e+00> : vector<16xf32>
    %213 = vector.multi_reduction <add>, %212, %cst_62 [1] : vector<16x16xf32> to vector<16xf32>
    %214 = vector.shape_cast %213 : vector<16xf32> to vector<16x1xf32>
    %215 = vector.broadcast %214 : vector<16x1xf32> to vector<16x16xf32>
    %216 = arith.divf %212, %215 : vector<16x16xf32>
    %cst_63 = arith.constant dense<0.000000e+00> : vector<16x8xf32>
    %217 = tpu.matmul %216, %203, %cst_63 {dimension_numbers = #tpu.dot_dimension_numbers<[1], [0], [0], [1], [0, 0, 1, 1], [], []>} : vector<16x16xf32>, vector<16x8xf32>, vector<16x8xf32> -> vector<16x8xf32>
    %218 = vector.extract_strided_slice %163 {offsets = [0, 24], sizes = [16, 8], strides = [1, 1]} : vector<16x32xf32> to vector<16x8xf32>
    %219 = vector.extract_strided_slice %165 {offsets = [24, 0], sizes = [8, 16], strides = [1, 1]} : vector<32x16xf32> to vector<8x16xf32>
    %220 = vector.extract_strided_slice %166 {offsets = [0, 24], sizes = [16, 8], strides = [1, 1]} : vector<16x32xf32> to vector<16x8xf32>
    %cst_64 = arith.constant dense<0.000000e+00> : vector<16x16xf32>
    %221 = tpu.matmul %218, %219, %cst_64 {dimension_numbers = #tpu.dot_dimension_numbers<[1], [0], [0], [1], [0, 0, 1, 1], [], []>} : vector<16x8xf32>, vector<8x16xf32>, vector<16x16xf32> -> vector<16x16xf32>
    %cst_65 = arith.constant 0.353553385 : f32
    %222 = vector.broadcast %cst_65 : f32 to vector<16x16xf32>
    %223 = arith.mulf %221, %222 : vector<16x16xf32>
    %224 = arith.addf %223, %57 : vector<16x16xf32>
    %cst_66 = arith.constant dense<0xFF800000> : vector<16xf32>
    %225 = vector.multi_reduction <maximumf>, %224, %cst_66 [1] : vector<16x16xf32> to vector<16xf32>
    %226 = vector.shape_cast %225 : vector<16xf32> to vector<16x1xf32>
    %227 = vector.broadcast %226 : vector<16x1xf32> to vector<16x16xf32>
    %228 = arith.subf %224, %227 : vector<16x16xf32>
    %229 = math.exp %228 : vector<16x16xf32>
    %cst_67 = arith.constant dense<0.000000e+00> : vector<16xf32>
    %230 = vector.multi_reduction <add>, %229, %cst_67 [1] : vector<16x16xf32> to vector<16xf32>
    %231 = vector.shape_cast %230 : vector<16xf32> to vector<16x1xf32>
    %232 = vector.broadcast %231 : vector<16x1xf32> to vector<16x16xf32>
    %233 = arith.divf %229, %232 : vector<16x16xf32>
    %cst_68 = arith.constant dense<0.000000e+00> : vector<16x8xf32>
    %234 = tpu.matmul %233, %220, %cst_68 {dimension_numbers = #tpu.dot_dimension_numbers<[1], [0], [0], [1], [0, 0, 1, 1], [], []>} : vector<16x16xf32>, vector<16x8xf32>, vector<16x8xf32> -> vector<16x8xf32>
    %235 = tpu.concatenate %183, %200, %217, %234 in 1 : vector<16x8xf32>, vector<16x8xf32>, vector<16x8xf32>, vector<16x8xf32> -> vector<16x32xf32>
    %236 = arith.addf %159, %235 : vector<16x32xf32>
    %237 = vector.extract_strided_slice %9 {offsets = [2, 0], sizes = [1, 32], strides = [1, 1]} : vector<6x32xf32> to vector<1x32xf32>
    %238 = vector.extract_strided_slice %9 {offsets = [3, 0], sizes = [1, 32], strides = [1, 1]} : vector<6x32xf32> to vector<1x32xf32>
    %cst_69 = arith.constant dense<0.000000e+00> : vector<16xf32>
    %239 = vector.multi_reduction <add>, %236, %cst_69 [1] : vector<16x32xf32> to vector<16xf32>
    %240 = vector.shape_cast %239 : vector<16xf32> to vector<16x1xf32>
    %cst_70 = arith.constant 3.200000e+01 : f32
    %241 = vector.broadcast %cst_70 : f32 to vector<16x1xf32>
    %242 = arith.divf %240, %241 : vector<16x1xf32>
    %243 = vector.broadcast %242 : vector<16x1xf32> to vector<16x32xf32>
    %244 = arith.subf %236, %243 : vector<16x32xf32>
    %245 = arith.mulf %244, %244 : vector<16x32xf32>
    %cst_71 = arith.constant dense<0.000000e+00> : vector<16xf32>
    %246 = vector.multi_reduction <add>, %245, %cst_71 [1] : vector<16x32xf32> to vector<16xf32>
    %247 = vector.shape_cast %246 : vector<16xf32> to vector<16x1xf32>
    %cst_72 = arith.constant 3.200000e+01 : f32
    %248 = vector.broadcast %cst_72 : f32 to vector<16x1xf32>
    %249 = arith.divf %247, %248 : vector<16x1xf32>
    %250 = vector.broadcast %242 : vector<16x1xf32> to vector<16x32xf32>
    %251 = arith.subf %236, %250 : vector<16x32xf32>
    %252 = vector.broadcast %237 : vector<1x32xf32> to vector<16x32xf32>
    %253 = arith.mulf %252, %251 : vector<16x32xf32>
    %cst_73 = arith.constant 9.99999974E-6 : f32
    %254 = vector.broadcast %cst_73 : f32 to vector<16x1xf32>
    %255 = arith.addf %249, %254 : vector<16x1xf32>
    %256 = math.rsqrt %255 : vector<16x1xf32>
    %257 = vector.broadcast %256 : vector<16x1xf32> to vector<16x32xf32>
    %258 = arith.mulf %253, %257 : vector<16x32xf32>
    %259 = vector.broadcast %238 : vector<1x32xf32> to vector<16x32xf32>
    %260 = arith.addf %258, %259 : vector<16x32xf32>
    %cst_74 = arith.constant dense<0.000000e+00> : vector<16x64xf32>
    %261 = tpu.matmul %260, %2, %cst_74 {dimension_numbers = #tpu.dot_dimension_numbers<[1], [0], [0], [1], [0, 0, 1, 1], [], []>} : vector<16x32xf32>, vector<32x64xf32>, vector<16x64xf32> -> vector<16x64xf32>
    %262 = vector.broadcast %7 : vector<1x64xf32> to vector<16x64xf32>
    %263 = arith.addf %261, %262 : vector<16x64xf32>
    %cst_75 = arith.constant 0.000000e+00 : f32
    %264 = vector.broadcast %cst_75 : f32 to vector<16x64xf32>
    %265 = arith.maximumf %263, %264 : vector<16x64xf32>
    %cst_76 = arith.constant dense<0.000000e+00> : vector<16x32xf32>
    %266 = tpu.matmul %265, %3, %cst_76 {dimension_numbers = #tpu.dot_dimension_numbers<[1], [0], [0], [1], [0, 0, 1, 1], [], []>} : vector<16x64xf32>, vector<64x32xf32>, vector<16x32xf32> -> vector<16x32xf32>
    %267 = vector.broadcast %8 : vector<1x32xf32> to vector<16x32xf32>
    %268 = arith.addf %266, %267 : vector<16x32xf32>
    %269 = arith.addf %260, %268 : vector<16x32xf32>
    %270 = vector.extract_strided_slice %9 {offsets = [4, 0], sizes = [1, 32], strides = [1, 1]} : vector<6x32xf32> to vector<1x32xf32>
    %271 = vector.extract_strided_slice %9 {offsets = [5, 0], sizes = [1, 32], strides = [1, 1]} : vector<6x32xf32> to vector<1x32xf32>
    %cst_77 = arith.constant dense<0.000000e+00> : vector<16xf32>
    %272 = vector.multi_reduction <add>, %269, %cst_77 [1] : vector<16x32xf32> to vector<16xf32>
    %273 = vector.shape_cast %272 : vector<16xf32> to vector<16x1xf32>
    %cst_78 = arith.constant 3.200000e+01 : f32
    %274 = vector.broadcast %cst_78 : f32 to vector<16x1xf32>
    %275 = arith.divf %273, %274 : vector<16x1xf32>
    %276 = vector.broadcast %275 : vector<16x1xf32> to vector<16x32xf32>
    %277 = arith.subf %269, %276 : vector<16x32xf32>
    %278 = arith.mulf %277, %277 : vector<16x32xf32>
    %cst_79 = arith.constant dense<0.000000e+00> : vector<16xf32>
    %279 = vector.multi_reduction <add>, %278, %cst_79 [1] : vector<16x32xf32> to vector<16xf32>
    %280 = vector.shape_cast %279 : vector<16xf32> to vector<16x1xf32>
    %cst_80 = arith.constant 3.200000e+01 : f32
    %281 = vector.broadcast %cst_80 : f32 to vector<16x1xf32>
    %282 = arith.divf %280, %281 : vector<16x1xf32>
    %283 = vector.broadcast %275 : vector<16x1xf32> to vector<16x32xf32>
    %284 = arith.subf %269, %283 : vector<16x32xf32>
    %285 = vector.broadcast %270 : vector<1x32xf32> to vector<16x32xf32>
    %286 = arith.mulf %285, %284 : vector<16x32xf32>
    %cst_81 = arith.constant 9.99999974E-6 : f32
    %287 = vector.broadcast %cst_81 : f32 to vector<16x1xf32>
    %288 = arith.addf %282, %287 : vector<16x1xf32>
    %289 = math.rsqrt %288 : vector<16x1xf32>
    %290 = vector.broadcast %289 : vector<16x1xf32> to vector<16x32xf32>
    %291 = arith.mulf %286, %290 : vector<16x32xf32>
    %292 = vector.broadcast %271 : vector<1x32xf32> to vector<16x32xf32>
    %293 = arith.addf %291, %292 : vector<16x32xf32>
    %c0_82 = arith.constant 0 : index
    %c0_83 = arith.constant 0 : index
    %294 = vector.load %arg3[%c0_82, %c0_83] : memref<16x32xf32, #tpu.memory_space<vmem>>, vector<16x32xf32>
    tpu.vector_store %arg3[%c0_82, %c0_83], %293 {strides = array<i32>} : memref<16x32xf32, #tpu.memory_space<vmem>>, vector<16x32xf32>,
    return
  }
}

</mosaic_0001>

<bundles_post_ra>
// kernel: tpu_custom_call.1
= control target key start
LH: loop header
LB: loop body
LE: loop exit
PB: predicated region body
PF: predicated region fallthrough
CT: control target
= control target key end

     0   :  { %8 = vsyncpa [#allocation3], 0  ;;  %s2337_s0 = inlined_call_operand.vmem [shape: f32[16,32], index: 0, kind: input, shape index: {}]   ;;  %s2338_s1 = inlined_call_operand.vmem [shape: f32[16,8], index: 1, kind: input, shape index: {}]   ;;  %s2339_s2 = inlined_call_operand.hbm [shape: f32[176,128], index: 2, kind: input, shape index: {}]   ;;  %s2340_s3 = inlined_call_operand.hbm [shape: f32[16,32], index: 3, kind: output, shape index: {}]  }
   0x1   :  { %9 = vsyncpa [#allocation4], 0  ;;  %s18_s14 = sshll.u32 %s2339_s2, 4  ;;  %s1831_s15 = smov [#allocation2]   ;;  %s19_s14 = int_to_ptr.hbm [resolvable:$true] %s18_s14 }
   0x2   :  { %s20_s16 = sshll.u32 %s1831_s15, 4  ;;  %s1832_s17 = smov 128   ;;  %s21_s16 = int_to_ptr.vmem [resolvable:$true] %s20_s16 }
   0x3   :  { %s1833_s18 = smov 8  }
   0x4   :  { %26 = dma.hbm_to_vmem [thread:$0]  %s19_s14, 2816, %s21_s16, [#allocation3], %s1832_s17, %s1832_s17, %s1833_s18  }
   0x5   :  { %1827 = dma.done.wait [#allocation3], 2816  }
   0x6   :  { %1828 = vsyncadd [#allocation3], 4294964480  ;;  %v55_v0 = vlaneseq  ;;  %v1834_v4 = vmov 1.0   ;;  %v53_v5 = vld [vmem:[%s2338_s1] sm:$0xff]  ;;  %vm80_vm1 = vcmask 64512   ;;  %v34_v6 = vld [vmem:[#allocation2 + $0x18] sm:$0xff] }
   0x7   :  { %vm77_vm2 = vcmp.ne.f32.partialorder %v53_v5, 0.0  ;;  %v33_v7 = vld [vmem:[#allocation2 + $0x10] sm:$0xff]  ;;  %v1835_v8 = vmov 0.0   ;;  %v32_v10 = vld [vmem:[#allocation2 + $0x8] sm:$0xff]  ;;  %v31_v11 = vld [vmem:[#allocation2] sm:$0xff]  ;;  %vm197_vm3 = vcmask 261120  }
   0x8   :  { %v1878_v1 = vand.u32 127, %v55_v0  ;;  %v1880_v2 = vshrl.u32 %v55_v0, 7  ;;  %v1573_v9 = vsel %vm77_vm2, 1.0, %v1835_v8  ;;  %v1891_v12 = vld [vmem:[%s2337_s0] sm:$0xff]  ;;  %v1898_v13 = vld [vmem:[%s2337_s0 + $0x8] sm:$0xff]  ;;  %s1836_s0 = smov 120  }
   0x9   :  { %v54_v14 = vld [vmem:[%s2338_s1 + $0x8] sm:$0xff]  ;;  %v1906_v17 = vld [vmem:[#allocation2 + $0xa0] sm:$0xff]  ;;  %s1837_s26 = smov 96   ;;  %s1838_s1 = smov 80   ;;  %v1843_v46 = vmov -1e+09  }
   0xa   :  { %v68_v3 = vand.u32 7, %v1878_v1  ;;  %vm139_vm4 = vcmp.ne.f32.partialorder %v54_v14, 0.0  ;;  %v196_v18 = vperm.slane %v1906_v17, 0  ;;  %s1839_s27 = smov 88   ;;  %s1840_s28 = smov 72   ;;  %v60_v23 = vand.u32 7, %v1880_v2 }
   0xb   :  { %v1578_v15 = vsel %vm139_vm4, 1.0, %v1835_v8  ;;  %s1841_s29 = smov 104   ;;  %s1842_s30 = smov 112   ;;  %v59_v26 = vadd.s32 8, %v1880_v2  ;;  %v72_v43 = vshrl.u32 %v1880_v2, 3  ;;  %v74_v44 = vshrl.u32 %v1878_v1, 3 }
   0xc   :  { %vm69_vm0 = vcmp.eq.s32.totalorder %v1880_v2, %v68_v3  ;;  %vm62_vm5 = vcmp.eq.s32.totalorder %v1878_v1, %v60_v23  ;;  %vm268_vm15 = vcmask 130048   ;;  %s1844_s4 = smov 64   ;;  %s1845_s5 = smov 48  }
   0xd   :  { %1574 = vmatpush.msk.msra.mxu0 %vm69_vm0, %v1834_v4  ;;  %1579 = vmatpush.msk.msra.mxu2 %vm69_vm0, %v1834_v4  ;;  %v1570_v24 = vsel %vm62_vm5, 1.0, %v1835_v8  ;;  %v61_v27 = vand.u32 7, %v59_v26  ;;  %vm75_vm7 = vcmp.eq.s32.totalorder %v72_v43, %v74_v44  ;;  %v73_v48 = vshrl.u32 %v59_v26, 3  ;;  %s1846_s6 = smov 56   ;;  %s1847_s7 = smov 40  }
   0xe   :  { %1575 = vmatmul.msk.f32.vlgmr.msra.gmra.mxu0 %vm80_vm1, %v1573_v9  ;;  %1580 = vmatmul.msk.f32.vlgmr.msra.gmra.mxu2 %vm80_vm1, %v1578_v15  ;;  %s1848_s8 = smov 16   ;;  %s1849_s9 = smov 24  }
   0xf   :  { %216 = vmatpush.msrb.mxu0 %v34_v6  ;;  %vm63_vm6 = vcmp.eq.s32.totalorder %v1878_v1, %v61_v27  ;;  %vm1971_vm10 = vcmp.eq.s32.totalorder %v73_v48, %v74_v44  ;;  %s1851_s10 = smov [#allocation5]   ;;  %s1557_s14 = sshll.u32 %s2340_s3, 4  ;;  %s1558_s14 = int_to_ptr.hbm [resolvable:$true] %s1557_s14 }
  0x10   :  { %v1571_v28 = vsel %vm63_vm6, 1.0, %v1835_v8  ;;  %s1555_s11 = sshll.u32 %s1851_s10, 4  ;;  %s1556_s11 = int_to_ptr.vmem [resolvable:$true] %s1555_s11 }
  0x11   :  { %217 = vmatpush.msrb.mxu0 %v33_v7 }
  0x13   :  { %218 = vmatpush.msrb.mxu0 %v32_v10 }
  0x15   :  { %219 = vmatpush.msrb.mxu0 %v31_v11 }
  0x16   :  { %1583 = vmatmul.msk.f32.vlgmr.msrb.gmra.mxu0 %vm197_vm3, %v1891_v12 }
  0x1e   :  { %1584 = vmatmul.msk.f32.gmra.mxu0 %vm197_vm3, %v1898_v13 }
  0x8b   :  { %v101_v16 = vpop.f32.mrf.mxu0 }
  0x8c   :  { %125 = vmatpush.msra.mxu1 %v101_v16 }
  0x8d   :  { %1576 = vmatmul.msk.f32.vlgmr.msra.gmra.mxu1 %vm80_vm1, %v1570_v24 }
  0x91   :  { %v162_v25 = vpop.f32.mrf.mxu2 }
  0x92   :  { %180 = vmatpush.msra.mxu3 %v162_v25 }
  0x93   :  { %v221_v19 = vpop.f32.mrf.mxu0  ;;  %1581 = vmatmul.msk.f32.vlgmr.msra.gmra.mxu3 %vm80_vm1, %v1570_v24 }
  0x94   :  { %v1909_v20 = vadd.f32 %v221_v19, %v196_v18 }
  0x95   :  { %1577 = vmatmul.msk.f32.gmra.mxu1 %vm80_vm1, %v1571_v28 }
  0x96   :  { %352 = vrot.lane.b32.xlu2 %v1909_v20, %s1836_s0  ;;  %229 = vrot.lane.b32.xlu1 %v1909_v20, %s1837_s26 }
  0x9b   :  { %v224_v21 = vpop.f32.mrf.mxu0  ;;  %1582 = vmatmul.msk.f32.gmra.mxu3 %vm80_vm1, %v1571_v28 }
  0x9c   :  { %v1915_v22 = vadd.f32 %v224_v21, %v196_v18 }
  0x9e   :  { %231 = vrot.lane.b32.xlu0 %v1915_v22, %s1837_s26  ;;  %482 = vrot.lane.b32.xlu2 %v1909_v20, %s1838_s1 }
  0x9f   :  { %356 = vrot.lane.b32.xlu1 %v1909_v20, %s1839_s27 }
  0xa6   :  { %358 = vrot.lane.b32.xlu0 %v1915_v22, %s1839_s27  ;;  %354 = vrot.lane.b32.xlu2 %v1915_v22, %s1836_s0 }
  0xa7   :  { %610 = vrot.lane.b32.xlu1 %v1915_v22, %s1840_s28 }
  0xae   :  { %484 = vrot.lane.b32.xlu0 %v1915_v22, %s1838_s1  ;;  %604 = vrot.lane.b32.xlu2 %v1909_v20, %s1841_s29 }
  0xaf   :  { %478 = vrot.lane.b32.xlu1 %v1909_v20, %s1842_s30 }
  0xb6   :  { %608 = vrot.lane.b32.xlu0 %v1909_v20, %s1840_s28 }
  0xb7   :  { %606 = vrot.lane.b32.xlu1 %v1915_v22, %s1841_s29 }
  0xbe   :  { %480 = vrot.lane.b32.xlu0 %v1915_v22, %s1842_s30 }
  0xf0   :  { %v353_v31 = vpop.permute.xlu2 %352 }
  0xf8   :  { %v483_v34 = vpop.permute.xlu2 %482 }
 0x100   :  { %v355_v37 = vpop.permute.xlu2 %354 }
 0x108   :  { %v230_v29 = vpop.permute.xlu1 %229  ;;  %v605_v40 = vpop.permute.xlu2 %604 }
 0x10a   :  { %v127_v52 = vpop.f32.mrf.mxu1 }
 0x10b   :  { %vm133_vm13 = vcmp.gt.f32.partialorder %v127_v52, 0.5 }
 0x10c   :  { %vm135_vm14 = vmand %vm75_vm7, %vm133_vm13 }
 0x10d   :  { %v137_v54 = vsel %vm135_vm14, 0.0, %v1843_v46 }
 0x110   :  { %v232_v30 = vpop.permute.xlu0 %231 }
 0x111   :  { %1585 = vmatpush.xpose.msk.msrb.mxu2 %vm80_vm1, %v232_v30  ;;  %v357_v32 = vpop.permute.xlu1 %356 }
 0x112   :  { %v130_v53 = vpop.f32.mrf.mxu1 }
 0x113   :  { %vm134_vm0 = vcmp.gt.f32.partialorder %v130_v53, 0.5 }
 0x114   :  { %vm136_vm2 = vmand %vm1971_vm10, %vm134_vm0 }
 0x115   :  { %1586 = vmatpush.xpose.msk.msrb.mxu2 %vm80_vm1, %v230_v29  ;;  %v138_v59 = vsel %vm136_vm2, 0.0, %v1843_v46  ;;  %v1991_v29 = vpack.i.bf16 %v1909_v20, %v1915_v22 }
 0x116   :  { %v182_v45 = vpop.f32.mrf.mxu3 }
 0x117   :  { %vm188_vm8 = vcmp.gt.f32.partialorder %v182_v45, 0.5 }
 0x118   :  { %v359_v33 = vpop.permute.xlu0 %358  ;;  %1587 = vmatmul.msk.f32.vlgmr.msrb.gmra.mxu2 %vm80_vm1, %v1909_v20  ;;  %vm190_vm9 = vmand %vm75_vm7, %vm188_vm8 }
 0x119   :  { %1591 = vmatpush.xpose.msk.msrb.mxu3 %vm80_vm1, %v359_v33  ;;  %v611_v35 = vpop.permute.xlu1 %610  ;;  %v1969_v47 = vsel %vm190_vm9, 0.0, %v1843_v46 }
 0x11d   :  { %1592 = vmatpush.xpose.msk.msrb.mxu3 %vm80_vm1, %v357_v32 }
 0x11e   :  { %v185_v50 = vpop.f32.mrf.mxu3 }
 0x11f   :  { %vm189_vm11 = vcmp.gt.f32.partialorder %v185_v50, 0.5 }
 0x120   :  { %v485_v36 = vpop.permute.xlu0 %484  ;;  %1588 = vmatmul.msk.f32.gmra.mxu2 %vm80_vm1, %v1915_v22  ;;  %1593 = vmatmul.msk.f32.vlgmr.msrb.gmra.mxu3 %vm80_vm1, %v353_v31  ;;  %vm191_vm12 = vmand %vm1971_vm10, %vm189_vm11 }
 0x121   :  { %1603 = vmatpush.xpose.msk.msra.mxu3 %vm80_vm1, %v611_v35  ;;  %1597 = vmatpush.xpose.msk.msra.mxu2 %vm80_vm1, %v485_v36  ;;  %v479_v38 = vpop.permute.xlu1 %478  ;;  %v1977_v51 = vsel %vm191_vm12, 0.0, %v1843_v46 }
 0x125   :  { %1598 = vmatpush.xpose.msk.msra.mxu2 %vm80_vm1, %v483_v34 }
 0x128   :  { %v609_v39 = vpop.permute.xlu0 %608  ;;  %1594 = vmatmul.msk.f32.gmra.mxu3 %vm80_vm1, %v355_v37  ;;  %1599 = vmatmul.msk.f32.vlgmr.msra.gmra.mxu2 %vm80_vm1, %v479_v38 }
 0x129   :  { %1604 = vmatpush.xpose.msk.msra.mxu3 %vm80_vm1, %v609_v39  ;;  %v607_v42 = vpop.permute.xlu1 %606 }
 0x130   :  { %v481_v41 = vpop.permute.xlu0 %480  ;;  %1605 = vmatmul.msk.f32.vlgmr.msra.gmra.mxu3 %vm80_vm1, %v605_v40 }
 0x131   :  { %1600 = vmatmul.msk.f32.gmra.mxu2 %vm80_vm1, %v481_v41 }
 0x138   :  { %1606 = vmatmul.msk.f32.gmra.mxu3 %vm80_vm1, %v607_v42 }
 0x19b   :  { %v258_v55 = vpop.f32.mrf.mxu2 }
 0x19c   :  { %v264_v56 = vmul.f32 0.35355338, %v258_v55 }
 0x19e   :  { %v266_v57 = vadd.f32 %v264_v56, %v137_v54 }
 0x1a0   :  { %v269_v58 = vsel %vm268_vm15, %v266_v57, -inf }
 0x1a1   :  { %270 = vmax.xlane.f32.xlu2 %v269_v58 }
 0x1a3   :  { %v261_v60 = vpop.f32.mrf.mxu2  ;;  %v385_v61 = vpop.f32.mrf.mxu3 }
 0x1a4   :  { %v265_v62 = vmul.f32 0.35355338, %v261_v60  ;;  %v391_v63 = vmul.f32 0.35355338, %v385_v61 }
 0x1a6   :  { %v267_v0 = vadd.f32 %v265_v62, %v138_v59  ;;  %v393_v1 = vadd.f32 %v391_v63, %v137_v54 }
 0x1a8   :  { %v272_v2 = vsel %vm268_vm15, %v267_v0, -inf  ;;  %v395_v3 = vsel %vm268_vm15, %v393_v1, -inf }
 0x1a9   :  { %273 = vmax.xlane.f32.xlu1 %v272_v2  ;;  %396 = vmax.xlane.f32.xlu0 %v395_v3 }
 0x1ab   :  { %v388_v4 = vpop.f32.mrf.mxu3  ;;  %v511_v5 = vpop.f32.mrf.mxu2 }
 0x1ac   :  { %v392_v6 = vmul.f32 0.35355338, %v388_v4  ;;  %v517_v8 = vmul.f32 0.35355338, %v511_v5 }
 0x1ae   :  { %v394_v7 = vadd.f32 %v392_v6, %v138_v59  ;;  %v519_v15 = vadd.f32 %v517_v8, %v137_v54 }
 0x1b0   :  { %v398_v9 = vsel %vm268_vm15, %v394_v7, -inf  ;;  %v521_v23 = vsel %vm268_vm15, %v519_v15, -inf }
 0x1b1   :  { %399 = vmax.xlane.f32.xlu2 %v398_v9 }
 0x1b3   :  { %v637_v10 = vpop.f32.mrf.mxu3 }
 0x1b4   :  { %v643_v11 = vmul.f32 0.35355338, %v637_v10  ;;  %v514_v14 = vpop.f32.mrf.mxu2 }
 0x1b5   :  { %v518_v16 = vmul.f32 0.35355338, %v514_v14 }
 0x1b6   :  { %v645_v18 = vadd.f32 %v643_v11, %v137_v54 }
 0x1b7   :  { %v520_v19 = vadd.f32 %v518_v16, %v138_v59 }
 0x1b8   :  { %v647_v21 = vsel %vm268_vm15, %v645_v18, -inf }
 0x1b9   :  { %648 = vmax.xlane.f32.xlu0 %v647_v21  ;;  %522 = vmax.xlane.f32.xlu2 %v521_v23  ;;  %v524_v24 = vsel %vm268_vm15, %v520_v19, -inf }
 0x1ba   :  { %525 = vmax.xlane.f32.xlu1 %v524_v24 }
 0x1bb   :  { %v640_v25 = vpop.f32.mrf.mxu3 }
 0x1bc   :  { %v644_v26 = vmul.f32 0.35355338, %v640_v25 }
 0x1be   :  { %v646_v27 = vadd.f32 %v644_v26, %v138_v59 }
 0x1c0   :  { %v650_v28 = vsel %vm268_vm15, %v646_v27, -inf }
 0x1c1   :  { %651 = vmax.xlane.f32.xlu2 %v650_v28 }
 0x1d9   :  { %1661 = vrot.lane.b32.xlu2 %v1991_v29, %s1844_s4 }
 0x214   :  { %v271_v30 = vpop.xlane.xlu2 %270 }
 0x215   :  { %v275_v31 = vsub.f32 %v266_v57, %v271_v30 }
 0x217   :  { %v277_v32 = vmul.f32 1.442695, %v275_v31 }
 0x219   :  { %1700 = vpow2.f32 %v277_v32 }
 0x21c   :  { %v397_v33 = vpop.xlane.xlu0 %396  ;;  %v274_v34 = vpop.xlane.xlu1 %273 }
 0x21d   :  { %v401_v35 = vsub.f32 %v393_v1, %v397_v33  ;;  %v276_v36 = vsub.f32 %v267_v0, %v274_v34 }
 0x21f   :  { %v1995_v37 = vpop.eup %1700  ;;  %v403_v38 = vmul.f32 1.442695, %v401_v35  ;;  %v279_v39 = vmul.f32 1.442695, %v276_v36 }
 0x220   :  { %v281_v20 = vsel %vm268_vm15, %v1995_v37, 0.0 }
 0x221   :  { %1702 = vpow2.f32 %v403_v38  ;;  %282 = vadd.xlane.f32.xlu0 %v281_v20 }
 0x222   :  { %1704 = vpow2.f32 %v279_v39 }
 0x224   :  { %v400_v22 = vpop.xlane.xlu2 %399 }
 0x225   :  { %v402_v40 = vsub.f32 %v394_v7, %v400_v22 }
 0x227   :  { %v1999_v41 = vpop.eup %1702  ;;  %v405_v42 = vmul.f32 1.442695, %v402_v40 }
 0x228   :  { %v2001_v43 = vpop.eup %1704  ;;  %v407_v44 = vsel %vm268_vm15, %v1999_v41, 0.0 }
 0x229   :  { %1706 = vpow2.f32 %v405_v42  ;;  %408 = vadd.xlane.f32.xlu1 %v407_v44  ;;  %v284_v45 = vsel %vm268_vm15, %v2001_v43, 0.0 }
 0x22a   :  { %285 = vadd.xlane.f32.xlu2 %v284_v45 }
 0x22c   :  { %v649_v46 = vpop.xlane.xlu0 %648  ;;  %v523_v48 = vpop.xlane.xlu2 %522 }
 0x22d   :  { %v653_v49 = vsub.f32 %v645_v18, %v649_v46  ;;  %v527_v50 = vsub.f32 %v519_v15, %v523_v48  ;;  %v526_v52 = vpop.xlane.xlu1 %525 }
 0x22e   :  { %v528_v56 = vsub.f32 %v520_v19, %v526_v52 }
 0x22f   :  { %v2007_v53 = vpop.eup %1706  ;;  %v655_v54 = vmul.f32 1.442695, %v653_v49  ;;  %v529_v55 = vmul.f32 1.442695, %v527_v50 }
 0x230   :  { %v410_v57 = vsel %vm268_vm15, %v2007_v53, 0.0  ;;  %v531_v58 = vmul.f32 1.442695, %v528_v56 }
 0x231   :  { %1708 = vpow2.f32 %v655_v54  ;;  %411 = vadd.xlane.f32.xlu0 %v410_v57 }
 0x232   :  { %1710 = vpow2.f32 %v529_v55 }
 0x233   :  { %1712 = vpow2.f32 %v531_v58 }
 0x234   :  { %v652_v59 = vpop.xlane.xlu2 %651 }
 0x235   :  { %v654_v61 = vsub.f32 %v646_v27, %v652_v59 }
 0x237   :  { %v2011_v60 = vpop.eup %1708  ;;  %v657_v1 = vmul.f32 1.442695, %v654_v61 }
 0x238   :  { %v2013_v62 = vpop.eup %1710  ;;  %v659_v63 = vsel %vm268_vm15, %v2011_v60, 0.0 }
 0x239   :  { %660 = vadd.xlane.f32.xlu0 %v659_v63  ;;  %v533_v0 = vsel %vm268_vm15, %v2013_v62, 0.0  ;;  %v2019_v3 = vpop.eup %1712  ;;  %1714 = vpow2.f32 %v657_v1 }
 0x23a   :  { %534 = vadd.xlane.f32.xlu1 %v533_v0  ;;  %v536_v6 = vsel %vm268_vm15, %v2019_v3, 0.0 }
 0x23c   :  { %v1662_v2 = vpop.permute.xlu2 %1661 }
 0x23d   :  { %v1663_v4 = vunpack.i.l.bf16 %v1662_v2  ;;  %v1664_v5 = vunpack.i.h.bf16 %v1662_v2 }
 0x23f   :  { %343 = vmatpush.msrb.mxu1 %v1663_v4  ;;  %v2025_v7 = vpop.eup %1714 }
 0x240   :  { %v662_v8 = vsel %vm268_vm15, %v2025_v7, 0.0 }
 0x241   :  { %344 = vmatpush.msrb.mxu1 %v1664_v5  ;;  %537 = vadd.xlane.f32.xlu0 %v536_v6 }
 0x242   :  { %1671 = vrot.lane.b32.xlu2 %v1991_v29, %s1845_s5 }
 0x249   :  { %663 = vadd.xlane.f32.xlu0 %v662_v8 }
 0x253   :  { %1666 = vrot.lane.b32.xlu1 %v1991_v29, %s1846_s6 }
 0x25d   :  { %1676 = vrot.lane.b32.xlu0 %v1991_v29, %s1847_s7 }
 0x294   :  { %v283_v9 = vpop.xlane.xlu0 %282 }
 0x295   :  { %1716 = vrcp.f32 %v283_v9  ;;  %v298_v18 = vand.u32 2147483648, %v283_v9  ;;  %v296_v19 = vand.u32 2147483647, %v283_v9  ;;  %vm292_vm5 = vweird.f32 %v283_v9 }
 0x297   :  { %v299_v24 = vor.u32 1.1754944e-38, %v298_v18  ;;  %vm297_vm7 = vcmp.eq.f32.partialorder %v296_v19, 8.507059e+37 }
 0x29b   :  { %v1717_v10 = vpop.eup %1716 }
 0x29c   :  { %v288_v11 = vmul.f32 %v1717_v10, %v283_v9  ;;  %vm293_vm4 = vweird.f32 %v1717_v10  ;;  %v2035_v28 = vpop.xlane.xlu1 %408 }
 0x29d   :  { %v286_v14 = vpop.xlane.xlu2 %285  ;;  %vm294_vm6 = vmor %vm292_vm5, %vm293_vm4  ;;  %vm418_vm5 = vweird.f32 %v2035_v28  ;;  %v422_v19 = vand.u32 2147483647, %v2035_v28 }
 0x29e   :  { %v289_v15 = vsub.f32 1.0, %v288_v11  ;;  %1718 = vrcp.f32 %v286_v14  ;;  %v313_v36 = vand.u32 2147483648, %v286_v14  ;;  %v311_v39 = vand.u32 2147483647, %v286_v14 }
 0x29f   :  { %1720 = vrcp.f32 %v2035_v28  ;;  %vm307_vm9 = vweird.f32 %v286_v14 }
 0x2a0   :  { %v290_v16 = vmul.f32 %v1717_v10, %v289_v15  ;;  %v314_v40 = vor.u32 1.1754944e-38, %v313_v36  ;;  %vm312_vm11 = vcmp.eq.f32.partialorder %v311_v39, 8.507059e+37  ;;  %v424_v15 = vand.u32 2147483648, %v2035_v28 }
 0x2a2   :  { %v291_v21 = vadd.f32 %v1717_v10, %v290_v16 }
 0x2a4   :  { %v1719_v23 = vpop.eup %1718  ;;  %v2033_v25 = vpop.xlane.xlu0 %411  ;;  %v295_v26 = vsel %vm294_vm6, %v1717_v10, %v291_v21 }
 0x2a5   :  { %v303_v27 = vmul.f32 %v1719_v23, %v286_v14  ;;  %v1672_v29 = vpop.permute.xlu2 %1671  ;;  %v300_v31 = vsel %vm297_vm7, %v299_v24, %v295_v26  ;;  %vm308_vm8 = vweird.f32 %v1719_v23  ;;  %v1721_v42 = vpop.eup %1720  ;;  %v439_v39 = vand.u32 2147483648, %v2033_v25 }
 0x2a6   :  { %v1673_v30 = vunpack.i.l.bf16 %v1672_v29  ;;  %v301_v33 = vmul.f32 %v1995_v37, %v300_v31  ;;  %v1674_v34 = vunpack.i.h.bf16 %v1672_v29  ;;  %vm309_vm10 = vmor %vm307_vm9, %vm308_vm8  ;;  %v414_v46 = vmul.f32 %v1721_v42, %v2035_v28 }
 0x2a7   :  { %v304_v32 = vsub.f32 1.0, %v303_v27  ;;  %vm419_vm2 = vweird.f32 %v1721_v42  ;;  %v425_v28 = vor.u32 1.1754944e-38, %v424_v15 }
 0x2a8   :  { %595 = vmatpush.msra.mxu1 %v1673_v30  ;;  %v415_v52 = vsub.f32 1.0, %v414_v46  ;;  %vm2061_vm6 = vmor %vm418_vm5, %vm419_vm2 }
 0x2a9   :  { %v305_v35 = vmul.f32 %v1719_v23, %v304_v32  ;;  %1589 = vmatmul.msk.f32.vlgmr.msrb.gmra.mxu1 %vm268_vm15, %v301_v33 }
 0x2aa   :  { %596 = vmatpush.msra.mxu1 %v1674_v34  ;;  %v416_v59 = vmul.f32 %v1721_v42, %v415_v52 }
 0x2ab   :  { %v306_v38 = vadd.f32 %v1719_v23, %v305_v35 }
 0x2ac   :  { %v2040_v20 = vpop.xlane.xlu0 %660  ;;  %v417_v6 = vadd.f32 %v1721_v42, %v416_v59 }
 0x2ad   :  { %v535_v22 = vpop.xlane.xlu1 %534  ;;  %v310_v37 = vsel %vm309_vm10, %v1719_v23, %v306_v38  ;;  %vm423_vm10 = vcmp.eq.f32.partialorder %v422_v19, 8.507059e+37  ;;  %vm670_vm2 = vweird.f32 %v2040_v20  ;;  %v674_v52 = vand.u32 2147483647, %v2040_v20 }
 0x2ae   :  { %1722 = vrcp.f32 %v535_v22  ;;  %v315_v44 = vsel %vm312_vm11, %v314_v40, %v310_v37  ;;  %v550_v56 = vand.u32 2147483648, %v535_v22  ;;  %v548_v58 = vand.u32 2147483647, %v535_v22 }
 0x2af   :  { %v316_v45 = vmul.f32 %v2001_v43, %v315_v44  ;;  %1724 = vrcp.f32 %v2033_v25  ;;  %vm544_vm13 = vweird.f32 %v535_v22  ;;  %v421_v23 = vsel %vm2061_vm6, %v1721_v42, %v417_v6 }
 0x2b0   :  { %v551_v0 = vor.u32 1.1754944e-38, %v550_v56  ;;  %vm549_vm0 = vcmp.eq.f32.partialorder %v548_v58, 8.507059e+37  ;;  %v426_v32 = vsel %vm423_vm10, %v425_v28, %v421_v23  ;;  %v437_v37 = vand.u32 2147483647, %v2033_v25 }
 0x2b1   :  { %1590 = vmatmul.msk.f32.gmra.mxu1 %vm268_vm15, %v316_v45  ;;  %v427_v40 = vmul.f32 %v1999_v41, %v426_v32  ;;  %v440_v45 = vor.u32 1.1754944e-38, %v439_v39  ;;  %vm675_vm5 = vcmp.eq.f32.partialorder %v674_v52, 8.507059e+37  ;;  %vm758_vm10 = vcmask 195584  }
 0x2b2   :  { %v1850_v32 = vmov 32.0  }
 0x2b4   :  { %v1723_v48 = vpop.eup %1722  ;;  %v538_v49 = vpop.xlane.xlu0 %537 }
 0x2b5   :  { %v540_v50 = vmul.f32 %v1723_v48, %v535_v22  ;;  %1726 = vrcp.f32 %v538_v49  ;;  %v2046_v55 = vpop.eup %1724  ;;  %vm545_vm12 = vweird.f32 %v1723_v48  ;;  %v565_v9 = vand.u32 2147483648, %v538_v49 }
 0x2b6   :  { %1728 = vrcp.f32 %v2040_v20  ;;  %v429_v61 = vmul.f32 %v2046_v55, %v2033_v25  ;;  %vm546_vm14 = vmor %vm544_vm13, %vm545_vm12  ;;  %v563_v18 = vand.u32 2147483647, %v538_v49  ;;  %vm559_vm7 = vweird.f32 %v538_v49 }
 0x2b7   :  { %v541_v54 = vsub.f32 1.0, %v540_v50  ;;  %v566_v27 = vor.u32 1.1754944e-38, %v565_v9  ;;  %vm434_vm11 = vweird.f32 %v2046_v55  ;;  %vm433_vm12 = vweird.f32 %v2033_v25 }
 0x2b8   :  { %v430_v8 = vsub.f32 1.0, %v429_v61  ;;  %vm564_vm9 = vcmp.eq.f32.partialorder %v563_v18, 8.507059e+37  ;;  %vm435_vm13 = vmor %vm433_vm12, %vm434_vm11  ;;  %v676_v25 = vand.u32 2147483648, %v2040_v20 }
 0x2b9   :  { %v542_v57 = vmul.f32 %v1723_v48, %v541_v54 }
 0x2ba   :  { %v431_v24 = vmul.f32 %v2046_v55, %v430_v8  ;;  %v677_v58 = vor.u32 1.1754944e-38, %v676_v25  ;;  %v35_v25 = vld [vmem:[#allocation2 + $0x20] sm:$0xff] }
 0x2bb   :  { %v1727_v43 = vpop.eup %1726  ;;  %v543_v63 = vadd.f32 %v1723_v48, %v542_v57 }
 0x2bc   :  { %v555_v1 = vmul.f32 %v1727_v43, %v538_v49  ;;  %v2051_v10 = vpop.xlane.xlu0 %663  ;;  %v2054_v14 = vpop.eup %1728  ;;  %vm560_vm4 = vweird.f32 %v1727_v43  ;;  %v432_v36 = vadd.f32 %v2046_v55, %v431_v24 }
 0x2bd   :  { %v547_v2 = vsel %vm546_vm14, %v1723_v48, %v543_v63  ;;  %1730 = vrcp.f32 %v2051_v10  ;;  %v666_v26 = vmul.f32 %v2054_v14, %v2040_v20  ;;  %vm561_vm8 = vmor %vm559_vm7, %vm560_vm4  ;;  %vm438_vm14 = vcmp.eq.f32.partialorder %v437_v37, 8.507059e+37 }
 0x2be   :  { %v552_v4 = vsel %vm549_vm0, %v551_v0, %v547_v2  ;;  %v556_v5 = vsub.f32 1.0, %v555_v1  ;;  %v436_v44 = vsel %vm435_vm13, %v2046_v55, %v432_v36  ;;  %vm671_vm0 = vweird.f32 %v2054_v14 }
 0x2bf   :  { %v553_v11 = vmul.f32 %v2013_v62, %v552_v4  ;;  %v667_v35 = vsub.f32 1.0, %v666_v26  ;;  %v441_v46 = vsel %vm438_vm14, %v440_v45, %v436_v44  ;;  %vm672_vm4 = vmor %vm670_vm2, %vm671_vm0  ;;  %v691_v61 = vand.u32 2147483648, %v2051_v10 }
 0x2c0   :  { %v557_v16 = vmul.f32 %v1727_v43, %v556_v5  ;;  %v442_v54 = vmul.f32 %v2007_v53, %v441_v46  ;;  %vm685_vm7 = vweird.f32 %v2051_v10  ;;  %v689_v20 = vand.u32 2147483647, %v2051_v10 }
 0x2c1   :  { %1601 = vmatmul.msk.f32.vlgmr.msra.gmra.mxu1 %vm268_vm15, %v553_v11  ;;  %v692_v0 = vor.u32 1.1754944e-38, %v691_v61  ;;  %1732 = vrcp.f32 %v1850_v32 }
 0x2c2   :  { %v558_v62 = vadd.f32 %v1727_v43, %v557_v16 }
 0x2c3   :  { %v1731_v38 = vpop.eup %1730 }
 0x2c4   :  { %v562_v29 = vsel %vm561_vm8, %v1727_v43, %v558_v62  ;;  %v681_v42 = vmul.f32 %v1731_v38, %v2051_v10  ;;  %vm686_vm6 = vweird.f32 %v1731_v38 }
 0x2c5   :  { %v1667_v30 = vpop.permute.xlu1 %1666  ;;  %v567_v31 = vsel %vm564_vm9, %v566_v27, %v562_v29  ;;  %vm687_vm8 = vmor %vm685_vm7, %vm686_vm6  ;;  %vm690_vm9 = vcmp.eq.f32.partialorder %v689_v20, 8.507059e+37 }
 0x2c6   :  { %v1668_v33 = vunpack.i.l.bf16 %v1667_v30  ;;  %v568_v34 = vmul.f32 %v2019_v3, %v567_v31  ;;  %v1669_v22 = vunpack.i.h.bf16 %v1667_v30  ;;  %v668_v3 = vmul.f32 %v2054_v14, %v667_v35 }
 0x2c7   :  { %v682_v41 = vsub.f32 1.0, %v681_v42 }
 0x2c8   :  { %469 = vmatpush.msra.mxu0 %v1668_v33  ;;  %v669_v48 = vadd.f32 %v2054_v14, %v668_v3 }
 0x2c9   :  { %1602 = vmatmul.msk.f32.gmra.mxu1 %vm268_vm15, %v568_v34  ;;  %v683_v57 = vmul.f32 %v1731_v38, %v682_v41  ;;  %v37_v41 = vld [vmem:[#allocation2 + $0x30] sm:$0xff] }
 0x2ca   :  { %470 = vmatpush.msra.mxu0 %v1669_v22  ;;  %v673_v56 = vsel %vm672_vm4, %v2054_v14, %v669_v48  ;;  %v38_v48 = vld [vmem:[#allocation2 + $0x38] sm:$0xff] }
 0x2cb   :  { %1595 = vmatmul.msk.f32.vlgmr.msra.gmra.mxu0 %vm268_vm15, %v427_v40  ;;  %v678_v43 = vsel %vm675_vm5, %v677_v58, %v673_v56  ;;  %v684_v59 = vadd.f32 %v1731_v38, %v683_v57  ;;  %839 = vmatpush.msrb.mxu2 %v38_v48 }
 0x2cc   :  { %v679_v53 = vmul.f32 %v2011_v60, %v678_v43 }
 0x2cd   :  { %v688_v63 = vsel %vm687_vm8, %v1731_v38, %v684_v59  ;;  %840 = vmatpush.msrb.mxu2 %v37_v41 }
 0x2ce   :  { %v693_v1 = vsel %vm690_vm9, %v692_v0, %v688_v63 }
 0x2cf   :  { %v1677_v49 = vpop.permute.xlu0 %1676  ;;  %v694_v2 = vmul.f32 %v2025_v7, %v693_v1 }
 0x2d0   :  { %v1678_v50 = vunpack.i.l.bf16 %v1677_v49  ;;  %v1679_v55 = vunpack.i.h.bf16 %v1677_v49  ;;  %v36_v49 = vld [vmem:[#allocation2 + $0x28] sm:$0xff] }
 0x2d1   :  { %841 = vmatpush.msrb.mxu2 %v36_v49 }
 0x2d2   :  { %721 = vmatpush.msrb.mxu0 %v1678_v50 }
 0x2d3   :  { %1596 = vmatmul.msk.f32.gmra.mxu0 %vm268_vm15, %v442_v54  ;;  %842 = vmatpush.msrb.mxu2 %v35_v25 }
 0x2d4   :  { %722 = vmatpush.msrb.mxu0 %v1679_v55 }
 0x2db   :  { %1607 = vmatmul.msk.f32.vlgmr.msrb.gmra.mxu0 %vm268_vm15, %v679_v53  ;;  %v790_v53 = vperm.slane %v1906_v17, 4 }
 0x2e3   :  { %1608 = vmatmul.msk.f32.gmra.mxu0 %vm268_vm15, %v694_v2  ;;  %v817_v2 = vperm.slane %v1906_v17, 5 }
 0x326   :  { %v346_v4 = vpop.f32.mrf.mxu1 }
 0x32e   :  { %v349_v5 = vpop.f32.mrf.mxu1 }
 0x33e   :  { %v598_v6 = vpop.f32.mrf.mxu1 }
 0x33f   :  { %740 = vrot.lane.b32.xlu2 %v598_v6, %s1848_s8 }
 0x346   :  { %v601_v10 = vpop.f32.mrf.mxu1 }
 0x348   :  { %v472_v60 = vpop.f32.mrf.mxu0 }
 0x349   :  { %732 = vrot.lane.b32.xlu1 %v472_v60, %s1833_s18 }
 0x350   :  { %v475_v8 = vpop.f32.mrf.mxu0 }
 0x351   :  { %734 = vrot.lane.b32.xlu2 %v475_v8, %s1833_s18 }
 0x358   :  { %v724_v9 = vpop.f32.mrf.mxu0 }
 0x359   :  { %748 = vrot.lane.b32.xlu1 %v724_v9, %s1849_s9 }
 0x360   :  { %v727_v7 = vpop.f32.mrf.mxu0 }
 0x361   :  { %742 = vrot.lane.b32.xlu1 %v601_v10, %s1848_s8  ;;  %750 = vrot.lane.b32.xlu0 %v727_v7, %s1849_s9 }
 0x399   :  { %v741_v14 = vpop.permute.xlu2 %740 }
 0x3ab   :  { %v735_v23 = vpop.permute.xlu2 %734 }
 0x3ac   :  { %v755_v24 = vsel %vm80_vm1, %v349_v5, %v735_v23 }
 0x3bb   :  { %v733_v11 = vpop.permute.xlu1 %732 }
 0x3bc   :  { %v754_v15 = vsel %vm80_vm1, %v346_v4, %v733_v11 }
 0x3bd   :  { %v756_v16 = vsel %vm268_vm15, %v754_v15, %v741_v14 }
 0x3cb   :  { %v749_v18 = vpop.permute.xlu1 %748 }
 0x3cc   :  { %v759_v19 = vsel %vm758_vm10, %v756_v16, %v749_v18  ;;  %v820_v18 = vperm.slane %v1906_v17, 1 }
 0x3cd   :  { %v761_v21 = vadd.f32 %v759_v19, %v1891_v12  ;;  %v1733_v12 = vpop.eup %1732 }
 0x3ce   :  { %v770_v33 = vmul.f32 32.0, %v1733_v12  ;;  %vm774_vm11 = vweird.f32 %v1733_v12 }
 0x3cf   :  { %v763_v62 = vsel %vm197_vm3, %v761_v21, 0.0 }
 0x3d0   :  { %764 = vadd.xlane.f32.xlu2 %v763_v62  ;;  %v771_v34 = vsub.f32 1.0, %v770_v33 }
 0x3d2   :  { %v772_v35 = vmul.f32 %v1733_v12, %v771_v34 }
 0x3d3   :  { %v743_v26 = vpop.permute.xlu1 %742  ;;  %v751_v27 = vpop.permute.xlu0 %750 }
 0x3d4   :  { %v757_v28 = vsel %vm268_vm15, %v755_v24, %v743_v26  ;;  %v773_v36 = vadd.f32 %v1733_v12, %v772_v35 }
 0x3d5   :  { %v760_v29 = vsel %vm758_vm10, %v757_v28, %v751_v27 }
 0x3d6   :  { %v762_v30 = vadd.f32 %v760_v29, %v1898_v13  ;;  %v2114_v38 = vsel %vm774_vm11, %v1733_v12, %v773_v36 }
 0x3d8   :  { %v766_v31 = vsel %vm197_vm3, %v762_v30, 0.0 }
 0x3d9   :  { %767 = vadd.xlane.f32.xlu1 %v766_v31 }
 0x443   :  { %v765_v39 = vpop.xlane.xlu2 %764 }
 0x444   :  { %v776_v22 = vmul.f32 %v2114_v38, %v765_v39 }
 0x446   :  { %v778_v40 = vsub.f32 %v761_v21, %v776_v22 }
 0x448   :  { %v780_v37 = vmul.f32 %v778_v40, %v778_v40  ;;  %v791_v1 = vmul.f32 %v790_v53, %v778_v40 }
 0x44a   :  { %v782_v13 = vsel %vm197_vm3, %v780_v37, 0.0 }
 0x44b   :  { %783 = vadd.xlane.f32.xlu0 %v782_v13 }
 0x44c   :  { %v768_v3 = vpop.xlane.xlu1 %767 }
 0x44d   :  { %v777_v42 = vmul.f32 %v2114_v38, %v768_v3 }
 0x44f   :  { %v779_v44 = vsub.f32 %v762_v30, %v777_v42 }
 0x451   :  { %v781_v45 = vmul.f32 %v779_v44, %v779_v44  ;;  %v792_v11 = vmul.f32 %v790_v53, %v779_v44 }
 0x453   :  { %v785_v46 = vsel %vm197_vm3, %v781_v45, 0.0 }
 0x454   :  { %786 = vadd.xlane.f32.xlu2 %v785_v46 }
 0x4be   :  { %v784_v50 = vpop.xlane.xlu0 %783 }
 0x4bf   :  { %v788_v52 = vmul.f32 %v784_v50, %v2114_v38 }
 0x4c1   :  { %v793_v54 = vadd.f32 1e-05, %v788_v52 }
 0x4c3   :  { %1734 = vrsqrt.f32 %v793_v54  ;;  %vm801_vm13 = vweird.f32 %v793_v54 }
 0x4c7   :  { %v787_v55 = vpop.xlane.xlu2 %786 }
 0x4c8   :  { %v789_v56 = vmul.f32 %v787_v55, %v2114_v38 }
 0x4c9   :  { %v1735_v57 = vpop.eup %1734 }
 0x4ca   :  { %v796_v58 = vmul.f32 %v1735_v57, %v793_v54  ;;  %v794_v43 = vadd.f32 1e-05, %v789_v56  ;;  %vm802_vm12 = vweird.f32 %v1735_v57 }
 0x4cb   :  { %vm803_vm14 = vmor %vm801_vm13, %vm802_vm12 }
 0x4cc   :  { %v797_v59 = vmul.f32 %v1735_v57, %v796_v58  ;;  %1736 = vrsqrt.f32 %v794_v43  ;;  %vm811_vm2 = vweird.f32 %v794_v43 }
 0x4ce   :  { %v798_v61 = vmul.f32 0.5, %v797_v59 }
 0x4d0   :  { %v799_v20 = vsub.f32 1.5, %v798_v61 }
 0x4d2   :  { %v1737_v63 = vpop.eup %1736  ;;  %v800_v0 = vmul.f32 %v1735_v57, %v799_v20 }
 0x4d3   :  { %v806_v4 = vmul.f32 %v1737_v63, %v794_v43  ;;  %vm812_vm0 = vweird.f32 %v1737_v63 }
 0x4d4   :  { %v804_v5 = vsel %vm803_vm14, %v1735_v57, %v800_v0  ;;  %vm813_vm4 = vmor %vm811_vm2, %vm812_vm0 }
 0x4d5   :  { %v815_v6 = vmul.f32 %v804_v5, %v791_v1  ;;  %v807_v60 = vmul.f32 %v1737_v63, %v806_v4 }
 0x4d7   :  { %v2124_v8 = vadd.f32 %v817_v2, %v815_v6  ;;  %v808_v9 = vmul.f32 0.5, %v807_v60 }
 0x4d9   :  { %v809_v10 = vsub.f32 1.5, %v808_v9  ;;  %1609 = vmatmul.msk.f32.vlgmr.msrb.gmra.mxu2 %vm197_vm3, %v2124_v8 }
 0x4db   :  { %v810_v7 = vmul.f32 %v1737_v63, %v809_v10 }
 0x4dd   :  { %v814_v14 = vsel %vm813_vm4, %v1737_v63, %v810_v7 }
 0x4de   :  { %v816_v15 = vmul.f32 %v814_v14, %v792_v11 }
 0x4e0   :  { %v2128_v16 = vadd.f32 %v817_v2, %v816_v15 }
 0x4e2   :  { %1610 = vmatmul.msk.f32.gmra.mxu2 %vm197_vm3, %v2128_v16 }
 0x55c   :  { %v844_v19 = vpop.f32.mrf.mxu2 }
 0x55d   :  { %v2133_v21 = vadd.f32 %v844_v19, %v820_v18 }
 0x55f   :  { %852 = vrot.lane.b32.xlu2 %v2133_v21, %s1837_s26 }
 0x565   :  { %v847_v62 = vpop.f32.mrf.mxu2 }
 0x566   :  { %v2137_v23 = vadd.f32 %v847_v62, %v820_v18 }
 0x567   :  { %1104 = vrot.lane.b32.xlu2 %v2133_v21, %s1838_s1 }
 0x568   :  { %980 = vrot.lane.b32.xlu0 %v2137_v23, %s1839_s27  ;;  %854 = vrot.lane.b32.xlu1 %v2137_v23, %s1837_s26 }
 0x56f   :  { %976 = vrot.lane.b32.xlu2 %v2137_v23, %s1836_s0 }
 0x570   :  { %974 = vrot.lane.b32.xlu1 %v2133_v21, %s1836_s0  ;;  %978 = vrot.lane.b32.xlu0 %v2133_v21, %s1839_s27 }
 0x577   :  { %1226 = vrot.lane.b32.xlu2 %v2133_v21, %s1841_s29 }
 0x578   :  { %1232 = vrot.lane.b32.xlu1 %v2137_v23, %s1840_s28  ;;  %1106 = vrot.lane.b32.xlu0 %v2137_v23, %s1838_s1 }
 0x580   :  { %1100 = vrot.lane.b32.xlu1 %v2133_v21, %s1842_s30  ;;  %1230 = vrot.lane.b32.xlu0 %v2133_v21, %s1840_s28 }
 0x588   :  { %1228 = vrot.lane.b32.xlu1 %v2137_v23, %s1841_s29  ;;  %1102 = vrot.lane.b32.xlu0 %v2137_v23, %s1842_s30 }
 0x5b9   :  { %v853_v17 = vpop.permute.xlu2 %852 }
 0x5c1   :  { %v1105_v27 = vpop.permute.xlu2 %1104 }
 0x5c9   :  { %v977_v32 = vpop.permute.xlu2 %976 }
 0x5d1   :  { %v1227_v34 = vpop.permute.xlu2 %1226 }
 0x5da   :  { %v981_v24 = vpop.permute.xlu0 %980  ;;  %v855_v26 = vpop.permute.xlu1 %854 }
 0x5db   :  { %1611 = vmatpush.xpose.msk.msrb.mxu1 %vm80_vm1, %v855_v26  ;;  %1617 = vmatpush.xpose.msk.msra.mxu0 %vm80_vm1, %v981_v24 }
 0x5df   :  { %1612 = vmatpush.xpose.msk.msrb.mxu1 %vm80_vm1, %v853_v17 }
 0x5e2   :  { %v975_v28 = vpop.permute.xlu1 %974  ;;  %v979_v29 = vpop.permute.xlu0 %978  ;;  %1613 = vmatmul.msk.f32.vlgmr.msrb.gmra.mxu1 %vm80_vm1, %v2133_v21 }
 0x5e3   :  { %1618 = vmatpush.xpose.msk.msra.mxu0 %vm80_vm1, %v979_v29 }
 0x5e6   :  { %1619 = vmatmul.msk.f32.vlgmr.msra.gmra.mxu0 %vm80_vm1, %v975_v28 }
 0x5ea   :  { %v1233_v30 = vpop.permute.xlu1 %1232  ;;  %v1107_v31 = vpop.permute.xlu0 %1106  ;;  %1614 = vmatmul.msk.f32.gmra.mxu1 %vm80_vm1, %v2137_v23 }
 0x5eb   :  { %1623 = vmatpush.xpose.msk.msra.mxu1 %vm80_vm1, %v1107_v31  ;;  %1629 = vmatpush.xpose.msk.msrb.mxu0 %vm80_vm1, %v1233_v30 }
 0x5ee   :  { %1620 = vmatmul.msk.f32.gmra.mxu0 %vm80_vm1, %v977_v32 }
 0x5ef   :  { %1624 = vmatpush.xpose.msk.msra.mxu1 %vm80_vm1, %v1105_v27 }
 0x5f2   :  { %v1101_v12 = vpop.permute.xlu1 %1100  ;;  %v1231_v33 = vpop.permute.xlu0 %1230 }
 0x5f3   :  { %1625 = vmatmul.msk.f32.vlgmr.msra.gmra.mxu1 %vm80_vm1, %v1101_v12  ;;  %1630 = vmatpush.xpose.msk.msrb.mxu0 %vm80_vm1, %v1231_v33 }
 0x5f6   :  { %1631 = vmatmul.msk.f32.vlgmr.msrb.gmra.mxu0 %vm80_vm1, %v1227_v34 }
 0x5fa   :  { %v1103_v35 = vpop.permute.xlu0 %1102  ;;  %v1229_v36 = vpop.permute.xlu1 %1228 }
 0x5fb   :  { %1626 = vmatmul.msk.f32.gmra.mxu1 %vm80_vm1, %v1103_v35 }
 0x5fe   :  { %1632 = vmatmul.msk.f32.gmra.mxu0 %vm80_vm1, %v1229_v36 }
 0x65f   :  { %v881_v39 = vpop.f32.mrf.mxu1 }
 0x660   :  { %v887_v22 = vmul.f32 0.35355338, %v881_v39 }
 0x662   :  { %v889_v40 = vadd.f32 %v887_v22, %v1969_v47 }
 0x663   :  { %v1007_v37 = vpop.f32.mrf.mxu0 }
 0x664   :  { %v1013_v13 = vmul.f32 0.35355338, %v1007_v37  ;;  %v891_v3 = vsel %vm268_vm15, %v889_v40, -inf }
 0x665   :  { %892 = vmax.xlane.f32.xlu2 %v891_v3 }
 0x666   :  { %v1015_v42 = vadd.f32 %v1013_v13, %v1969_v47 }
 0x667   :  { %v884_v44 = vpop.f32.mrf.mxu1 }
 0x668   :  { %v888_v45 = vmul.f32 0.35355338, %v884_v44  ;;  %v1017_v46 = vsel %vm268_vm15, %v1015_v42, -inf }
 0x669   :  { %1018 = vmax.xlane.f32.xlu0 %v1017_v46 }
 0x66a   :  { %v890_v48 = vadd.f32 %v888_v45, %v1977_v51 }
 0x66b   :  { %v1010_v41 = vpop.f32.mrf.mxu0 }
 0x66c   :  { %v1014_v49 = vmul.f32 0.35355338, %v1010_v41  ;;  %v894_v25 = vsel %vm268_vm15, %v890_v48, -inf }
 0x66d   :  { %895 = vmax.xlane.f32.xlu1 %v894_v25 }
 0x66e   :  { %v1016_v50 = vadd.f32 %v1014_v49, %v1977_v51 }
 0x670   :  { %v1133_v52 = vpop.f32.mrf.mxu1  ;;  %v1020_v54 = vsel %vm268_vm15, %v1016_v50, -inf }
 0x671   :  { %v1139_v55 = vmul.f32 0.35355338, %v1133_v52  ;;  %1021 = vmax.xlane.f32.xlu2 %v1020_v54 }
 0x673   :  { %v1259_v56 = vpop.f32.mrf.mxu0  ;;  %v1141_v57 = vadd.f32 %v1139_v55, %v1969_v47 }
 0x674   :  { %v1265_v58 = vmul.f32 0.35355338, %v1259_v56 }
 0x675   :  { %v1143_v43 = vsel %vm268_vm15, %v1141_v57, -inf }
 0x676   :  { %1144 = vmax.xlane.f32.xlu0 %v1143_v43  ;;  %v1267_v59 = vadd.f32 %v1265_v58, %v1969_v47  ;;  %v2201_v47 = vpack.i.bf16 %v2133_v21, %v2137_v23 }
 0x678   :  { %v1136_v61 = vpop.f32.mrf.mxu1  ;;  %v1269_v53 = vsel %vm268_vm15, %v1267_v59, -inf }
 0x679   :  { %v1140_v20 = vmul.f32 0.35355338, %v1136_v61  ;;  %1270 = vmax.xlane.f32.xlu1 %v1269_v53 }
 0x67b   :  { %v1262_v63 = vpop.f32.mrf.mxu0  ;;  %v1142_v0 = vadd.f32 %v1140_v20, %v1977_v51 }
 0x67c   :  { %v1266_v1 = vmul.f32 0.35355338, %v1262_v63 }
 0x67d   :  { %v1146_v2 = vsel %vm268_vm15, %v1142_v0, -inf }
 0x67e   :  { %v1268_v4 = vadd.f32 %v1266_v1, %v1977_v51  ;;  %1147 = vmax.xlane.f32.xlu2 %v1146_v2 }
 0x680   :  { %v1272_v5 = vsel %vm268_vm15, %v1268_v4, -inf }
 0x681   :  { %1273 = vmax.xlane.f32.xlu0 %v1272_v5 }
 0x695   :  { %1681 = vrot.lane.b32.xlu0 %v2201_v47, %s1844_s4 }
 0x6d8   :  { %v893_v6 = vpop.xlane.xlu2 %892 }
 0x6d9   :  { %v897_v60 = vsub.f32 %v889_v40, %v893_v6 }
 0x6db   :  { %v899_v9 = vmul.f32 1.442695, %v897_v60 }
 0x6dc   :  { %v1019_v10 = vpop.xlane.xlu0 %1018 }
 0x6dd   :  { %1738 = vpow2.f32 %v899_v9  ;;  %v1023_v7 = vsub.f32 %v1015_v42, %v1019_v10 }
 0x6df   :  { %v1025_v11 = vmul.f32 1.442695, %v1023_v7 }
 0x6e0   :  { %v896_v14 = vpop.xlane.xlu1 %895 }
 0x6e1   :  { %1740 = vpow2.f32 %v1025_v11  ;;  %v898_v51 = vsub.f32 %v890_v48, %v896_v14 }
 0x6e3   :  { %v2205_v15 = vpop.eup %1738  ;;  %v901_v18 = vmul.f32 1.442695, %v898_v51 }
 0x6e4   :  { %v1022_v19 = vpop.xlane.xlu2 %1021  ;;  %v903_v21 = vsel %vm268_vm15, %v2205_v15, 0.0 }
 0x6e5   :  { %1742 = vpow2.f32 %v901_v18  ;;  %v1024_v62 = vsub.f32 %v1016_v50, %v1022_v19  ;;  %904 = vadd.xlane.f32.xlu1 %v903_v21 }
 0x6e7   :  { %v2209_v23 = vpop.eup %1740  ;;  %v1027_v17 = vmul.f32 1.442695, %v1024_v62 }
 0x6e8   :  { %v1029_v24 = vsel %vm268_vm15, %v2209_v23, 0.0 }
 0x6e9   :  { %1744 = vpow2.f32 %v1027_v17  ;;  %v1145_v26 = vpop.xlane.xlu0 %1144  ;;  %1030 = vadd.xlane.f32.xlu2 %v1029_v24 }
 0x6ea   :  { %v1149_v27 = vsub.f32 %v1141_v57, %v1145_v26 }
 0x6eb   :  { %v2213_v28 = vpop.eup %1742 }
 0x6ec   :  { %v1151_v29 = vmul.f32 1.442695, %v1149_v27  ;;  %v1271_v30 = vpop.xlane.xlu1 %1270  ;;  %v906_v31 = vsel %vm268_vm15, %v2213_v28, 0.0 }
 0x6ed   :  { %v1275_v32 = vsub.f32 %v1267_v59, %v1271_v30  ;;  %907 = vadd.xlane.f32.xlu0 %v906_v31 }
 0x6ee   :  { %1746 = vpow2.f32 %v1151_v29 }
 0x6ef   :  { %v2217_v12 = vpop.eup %1744  ;;  %v1277_v33 = vmul.f32 1.442695, %v1275_v32 }
 0x6f0   :  { %v1032_v34 = vsel %vm268_vm15, %v2217_v12, 0.0 }
 0x6f1   :  { %1748 = vpow2.f32 %v1277_v33  ;;  %1033 = vadd.xlane.f32.xlu1 %v1032_v34  ;;  %v1148_v35 = vpop.xlane.xlu2 %1147 }
 0x6f2   :  { %v1150_v36 = vsub.f32 %v1142_v0, %v1148_v35 }
 0x6f4   :  { %v2221_v39 = vpop.eup %1746  ;;  %v1153_v22 = vmul.f32 1.442695, %v1150_v36  ;;  %v1274_v40 = vpop.xlane.xlu0 %1273 }
 0x6f5   :  { %v1155_v37 = vsel %vm268_vm15, %v2221_v39, 0.0  ;;  %v1276_v3 = vsub.f32 %v1268_v4, %v1274_v40 }
 0x6f6   :  { %1156 = vadd.xlane.f32.xlu2 %v1155_v37  ;;  %1750 = vpow2.f32 %v1153_v22 }
 0x6f7   :  { %v2225_v13 = vpop.eup %1748  ;;  %v1279_v44 = vmul.f32 1.442695, %v1276_v3 }
 0x6f8   :  { %v1281_v42 = vsel %vm268_vm15, %v2225_v13, 0.0 }
 0x6f9   :  { %1282 = vadd.xlane.f32.xlu1 %v1281_v42  ;;  %1752 = vpow2.f32 %v1279_v44 }
 0x6fc   :  { %v2229_v45 = vpop.eup %1750 }
 0x6fd   :  { %v1158_v46 = vsel %vm268_vm15, %v2229_v45, 0.0 }
 0x6ff   :  { %v2235_v48 = vpop.eup %1752 }
 0x700   :  { %v1284_v25 = vsel %vm268_vm15, %v2235_v48, 0.0 }
 0x701   :  { %1691 = vrot.lane.b32.xlu0 %v2201_v47, %s1845_s5  ;;  %1159 = vadd.xlane.f32.xlu1 %v1158_v46 }
 0x707   :  { %v1682_v41 = vpop.permute.xlu0 %1681 }
 0x708   :  { %v1683_v49 = vunpack.i.l.bf16 %v1682_v41  ;;  %v1684_v50 = vunpack.i.h.bf16 %v1682_v41 }
 0x709   :  { %1285 = vadd.xlane.f32.xlu1 %v1284_v25 }
 0x70a   :  { %965 = vmatpush.msrb.mxu3 %v1683_v49 }
 0x70c   :  { %966 = vmatpush.msrb.mxu3 %v1684_v50 }
 0x70e   :  { %1686 = vrot.lane.b32.xlu2 %v2201_v47, %s1846_s6 }
 0x722   :  { %1696 = vrot.lane.b32.xlu1 %v2201_v47, %s1847_s7 }
 0x758   :  { %v905_v52 = vpop.xlane.xlu1 %904 }
 0x759   :  { %1754 = vrcp.f32 %v905_v52  ;;  %v920_v59 = vand.u32 2147483648, %v905_v52  ;;  %v918_v53 = vand.u32 2147483647, %v905_v52  ;;  %vm914_vm6 = vweird.f32 %v905_v52 }
 0x75b   :  { %v921_v4 = vor.u32 1.1754944e-38, %v920_v59  ;;  %vm919_vm8 = vcmp.eq.f32.partialorder %v918_v53, 8.507059e+37 }
 0x75c   :  { %v1031_v54 = vpop.xlane.xlu2 %1030 }
 0x75d   :  { %1756 = vrcp.f32 %v1031_v54  ;;  %v1044_v10 = vand.u32 2147483647, %v1031_v54  ;;  %v1046_v51 = vand.u32 2147483648, %v1031_v54  ;;  %vm1040_vm11 = vweird.f32 %v1031_v54 }
 0x75f   :  { %v1755_v55 = vpop.eup %1754  ;;  %vm1045_vm14 = vcmp.eq.f32.partialorder %v1044_v10, 8.507059e+37  ;;  %v1047_v31 = vor.u32 1.1754944e-38, %v1046_v51 }
 0x760   :  { %v910_v56 = vmul.f32 %v1755_v55, %v905_v52  ;;  %v908_v57 = vpop.xlane.xlu0 %907  ;;  %vm915_vm5 = vweird.f32 %v1755_v55 }
 0x761   :  { %1758 = vrcp.f32 %v908_v57  ;;  %vm916_vm7 = vmor %vm914_vm6, %vm915_vm5  ;;  %v935_v21 = vand.u32 2147483648, %v908_v57  ;;  %v933_v24 = vand.u32 2147483647, %v908_v57  ;;  %vm929_vm0 = vweird.f32 %v908_v57 }
 0x762   :  { %v911_v58 = vsub.f32 1.0, %v910_v56 }
 0x763   :  { %v1757_v43 = vpop.eup %1756  ;;  %v936_v32 = vor.u32 1.1754944e-38, %v935_v21  ;;  %vm934_vm4 = vcmp.eq.f32.partialorder %v933_v24, 8.507059e+37 }
 0x764   :  { %v912_v61 = vmul.f32 %v1755_v55, %v911_v58  ;;  %v1036_v20 = vmul.f32 %v1757_v43, %v1031_v54  ;;  %v2243_v63 = vpop.xlane.xlu1 %1033  ;;  %vm1041_vm9 = vweird.f32 %v1757_v43 }
 0x765   :  { %1760 = vrcp.f32 %v2243_v63  ;;  %vm2257_vm13 = vmor %vm1040_vm11, %vm1041_vm9  ;;  %vm1055_vm5 = vweird.f32 %v2243_v63  ;;  %v1061_v34 = vand.u32 2147483648, %v2243_v63  ;;  %v1059_v42 = vand.u32 2147483647, %v2243_v63 }
 0x766   :  { %v913_v0 = vadd.f32 %v1755_v55, %v912_v61  ;;  %v1037_v1 = vsub.f32 1.0, %v1036_v20 }
 0x767   :  { %v1759_v2 = vpop.eup %1758  ;;  %v1062_v59 = vor.u32 1.1754944e-38, %v1061_v34 }
 0x768   :  { %v917_v5 = vsel %vm916_vm7, %v1755_v55, %v913_v0  ;;  %v1038_v47 = vmul.f32 %v1757_v43, %v1037_v1  ;;  %v925_v6 = vmul.f32 %v1759_v2, %v908_v57  ;;  %vm930_vm12 = vweird.f32 %v1759_v2 }
 0x769   :  { %v922_v60 = vsel %vm919_vm8, %v921_v4, %v917_v5  ;;  %v2246_v9 = vpop.xlane.xlu2 %1156  ;;  %vm931_vm2 = vmor %vm929_vm0, %vm930_vm12 }
 0x76a   :  { %v926_v7 = vsub.f32 1.0, %v925_v6  ;;  %1762 = vrcp.f32 %v2246_v9  ;;  %v1039_v14 = vadd.f32 %v1757_v43, %v1038_v47  ;;  %v923_v18 = vmul.f32 %v2205_v15, %v922_v60 }
 0x76b   :  { %v2249_v11 = vpop.eup %1760  ;;  %v1170_v25 = vand.u32 2147483647, %v2246_v9  ;;  %v1172_v50 = vand.u32 2147483648, %v2246_v9  ;;  %vm1166_vm9 = vweird.f32 %v2246_v9 }
 0x76c   :  { %v927_v19 = vmul.f32 %v1759_v2, %v926_v7  ;;  %v1051_v62 = vmul.f32 %v2249_v11, %v2243_v63  ;;  %v2254_v17 = vpop.xlane.xlu1 %1282  ;;  %1615 = vmatmul.msk.f32.vlgmr.msrb.gmra.mxu3 %vm268_vm15, %v923_v18  ;;  %v1043_v15 = vsel %vm2257_vm13, %v1757_v43, %v1039_v14  ;;  %vm1056_vm6 = vweird.f32 %v2249_v11 }
 0x76d   :  { %v1048_v40 = vsel %vm1045_vm14, %v1047_v31, %v1043_v15  ;;  %vm1057_vm8 = vmor %vm1055_vm5, %vm1056_vm6  ;;  %v1173_v61 = vor.u32 1.1754944e-38, %v1172_v50  ;;  %vm1171_vm12 = vcmp.eq.f32.partialorder %v1170_v25, 8.507059e+37  ;;  %vm1060_vm13 = vcmp.eq.f32.partialorder %v1059_v42, 8.507059e+37 }
 0x76e   :  { %v1052_v27 = vsub.f32 1.0, %v1051_v62  ;;  %v928_v29 = vadd.f32 %v1759_v2, %v927_v19  ;;  %v1049_v57 = vmul.f32 %v2209_v23, %v1048_v40  ;;  %v1298_v26 = vand.u32 2147483648, %v2254_v17 }
 0x76f   :  { %vm1292_vm6 = vweird.f32 %v2254_v17 }
 0x770   :  { %v1763_v30 = vpop.eup %1762  ;;  %v1053_v33 = vmul.f32 %v2249_v11, %v1052_v27  ;;  %v932_v22 = vsel %vm931_vm2, %v1759_v2, %v928_v29  ;;  %v1296_v27 = vand.u32 2147483647, %v2254_v17 }
 0x771   :  { %v1162_v35 = vmul.f32 %v1763_v30, %v2246_v9  ;;  %v1687_v36 = vpop.permute.xlu2 %1686  ;;  %v937_v3 = vsel %vm934_vm4, %v936_v32, %v932_v22  ;;  %vm1167_vm7 = vweird.f32 %v1763_v30 }
 0x772   :  { %v1688_v37 = vunpack.i.l.bf16 %v1687_v36  ;;  %v938_v41 = vmul.f32 %v2213_v28, %v937_v3  ;;  %v1054_v49 = vadd.f32 %v2249_v11, %v1053_v33  ;;  %v1689_v52 = vunpack.i.h.bf16 %v1687_v36  ;;  %vm1168_vm11 = vmor %vm1166_vm9, %vm1167_vm7 }
 0x773   :  { %v1163_v44 = vsub.f32 1.0, %v1162_v35  ;;  %v1692_v46 = vpop.permute.xlu0 %1691 }
 0x774   :  { %v1693_v54 = vunpack.i.l.bf16 %v1692_v46  ;;  %v1160_v55 = vpop.xlane.xlu1 %1159  ;;  %1091 = vmatpush.msra.mxu2 %v1688_v37  ;;  %1616 = vmatmul.msk.f32.gmra.mxu3 %vm268_vm15, %v938_v41  ;;  %v1694_v28 = vunpack.i.h.bf16 %v1692_v46  ;;  %v1058_v43 = vsel %vm1057_vm8, %v2249_v11, %v1054_v49  ;;  %vm1297_vm8 = vcmp.eq.f32.partialorder %v1296_v27, 8.507059e+37  ;;  %v46_v27 = vld [vmem:[#allocation2 + $0x78] sm:$0xff] }
 0x775   :  { %v1164_v56 = vmul.f32 %v1763_v30, %v1163_v44  ;;  %1764 = vrcp.f32 %v1160_v55  ;;  %v1063_v20 = vsel %vm1060_vm13, %v1062_v59, %v1058_v43  ;;  %v1187_v6 = vand.u32 2147483648, %v1160_v55 }
 0x776   :  { %1092 = vmatpush.msra.mxu2 %v1689_v52  ;;  %1217 = vmatpush.msra.mxu3 %v1693_v54  ;;  %1766 = vrcp.f32 %v2254_v17  ;;  %v1064_v2 = vmul.f32 %v2217_v12, %v1063_v20  ;;  %v1185_v9 = vand.u32 2147483647, %v1160_v55  ;;  %vm1181_vm0 = vweird.f32 %v1160_v55 }
 0x777   :  { %v1165_v58 = vadd.f32 %v1763_v30, %v1164_v56  ;;  %1621 = vmatmul.msk.f32.vlgmr.msra.gmra.mxu2 %vm268_vm15, %v1049_v57 }
 0x778   :  { %1218 = vmatpush.msra.mxu3 %v1694_v28  ;;  %vm1186_vm4 = vcmp.eq.f32.partialorder %v1185_v9, 8.507059e+37 }
 0x779   :  { %v1169_v23 = vsel %vm1168_vm11, %v1763_v30, %v1165_v58  ;;  %v1299_v30 = vor.u32 1.1754944e-38, %v1298_v26 }
 0x77a   :  { %v1174_v53 = vsel %vm1171_vm12, %v1173_v61, %v1169_v23 }
 0x77b   :  { %v1765_v63 = vpop.eup %1764  ;;  %v1175_v0 = vmul.f32 %v2221_v39, %v1174_v53  ;;  %v1188_v39 = vor.u32 1.1754944e-38, %v1187_v6 }
 0x77c   :  { %v1177_v1 = vmul.f32 %v1765_v63, %v1160_v55  ;;  %v1286_v5 = vpop.xlane.xlu1 %1285  ;;  %v1767_v47 = vpop.eup %1766  ;;  %vm1182_vm14 = vweird.f32 %v1765_v63 }
 0x77d   :  { %1627 = vmatmul.msk.f32.vlgmr.msra.gmra.mxu3 %vm268_vm15, %v1175_v0  ;;  %1768 = vrcp.f32 %v1286_v5  ;;  %v1288_v10 = vmul.f32 %v1767_v47, %v2254_v17  ;;  %vm1183_vm2 = vmor %vm1181_vm0, %vm1182_vm14  ;;  %vm1293_vm5 = vweird.f32 %v1767_v47  ;;  %v1313_v34 = vand.u32 2147483648, %v1286_v5 }
 0x77e   :  { %v1178_v4 = vsub.f32 1.0, %v1177_v1  ;;  %vm1294_vm7 = vmor %vm1292_vm6, %vm1293_vm5  ;;  %vm1307_vm11 = vweird.f32 %v1286_v5  ;;  %v1311_v22 = vand.u32 2147483647, %v1286_v5 }
 0x77f   :  { %1622 = vmatmul.msk.f32.gmra.mxu2 %vm268_vm15, %v1064_v2  ;;  %v1289_v12 = vsub.f32 1.0, %v1288_v10  ;;  %v1314_v40 = vor.u32 1.1754944e-38, %v1313_v34 }
 0x780   :  { %v1179_v60 = vmul.f32 %v1765_v63, %v1178_v4  ;;  %vm1312_vm13 = vcmp.eq.f32.partialorder %v1311_v22, 8.507059e+37 }
 0x781   :  { %v1290_v19 = vmul.f32 %v1767_v47, %v1289_v12 }
 0x782   :  { %v1180_v7 = vadd.f32 %v1765_v63, %v1179_v60 }
 0x783   :  { %v1769_v18 = vpop.eup %1768  ;;  %v1291_v62 = vadd.f32 %v1767_v47, %v1290_v19  ;;  %v49_v19 = vld [vmem:[#allocation2 + $0x90] sm:$0xff] }
 0x784   :  { %v1184_v11 = vsel %vm1183_vm2, %v1765_v63, %v1180_v7  ;;  %v1303_v21 = vmul.f32 %v1769_v18, %v1286_v5  ;;  %vm1308_vm9 = vweird.f32 %v1769_v18  ;;  %v41_v7 = vld [vmem:[#allocation2 + $0x50] sm:$0xff] }
 0x785   :  { %v1189_v14 = vsel %vm1186_vm4, %v1188_v39, %v1184_v11  ;;  %v1295_v15 = vsel %vm1294_vm7, %v1767_v47, %v1291_v62  ;;  %vm1309_vm12 = vmor %vm1307_vm11, %vm1308_vm9  ;;  %v40_v39 = vld [vmem:[#allocation2 + $0x48] sm:$0xff]  ;;  %v39_v11 = vld [vmem:[#allocation2 + $0x40] sm:$0xff]  ;;  %vm1467_vm4 = vcmask 523264  }
 0x786   :  { %v1190_v51 = vmul.f32 %v2229_v45, %v1189_v14  ;;  %v1304_v24 = vsub.f32 1.0, %v1303_v21  ;;  %v1300_v31 = vsel %vm1297_vm8, %v1299_v30, %v1295_v15  ;;  %v48_v21 = vld [vmem:[#allocation2 + $0x88] sm:$0xff]  ;;  %v47_v62 = vld [vmem:[#allocation2 + $0x80] sm:$0xff] }
 0x787   :  { %v1301_v36 = vmul.f32 %v2225_v13, %v1300_v31 }
 0x788   :  { %1628 = vmatmul.msk.f32.gmra.mxu3 %vm268_vm15, %v1190_v51  ;;  %v1305_v29 = vmul.f32 %v1769_v18, %v1304_v24 }
 0x78a   :  { %v1306_v33 = vadd.f32 %v1769_v18, %v1305_v29 }
 0x78c   :  { %v1310_v17 = vsel %vm1309_vm12, %v1769_v18, %v1306_v33  ;;  %v50_v18 = vld [vmem:[#allocation2 + $0x98] sm:$0xff] }
 0x78d   :  { %v1315_v37 = vsel %vm1312_vm13, %v1314_v40, %v1310_v17  ;;  %1482 = vmatpush.msrb.mxu3 %v50_v18 }
 0x78e   :  { %v1316_v3 = vmul.f32 %v2235_v48, %v1315_v37 }
 0x78f   :  { %1483 = vmatpush.msrb.mxu3 %v49_v19 }
 0x791   :  { %1484 = vmatpush.msrb.mxu3 %v48_v21 }
 0x793   :  { %1485 = vmatpush.msrb.mxu3 %v47_v62 }
 0x794   :  { %v1697_v45 = vpop.permute.xlu1 %1696 }
 0x795   :  { %v1698_v32 = vunpack.i.l.bf16 %v1697_v45  ;;  %v1699_v35 = vunpack.i.h.bf16 %v1697_v45  ;;  %1486 = vmatpush.msrb.mxu3 %v46_v27 }
 0x797   :  { %1343 = vmatpush.msrb.mxu2 %v1698_v32  ;;  %v1778_v32 = vld [vmem:[#allocation2 + $0xa0] sm:$0xff] }
 0x798   :  { %v1404_v33 = vperm.slane %v1778_v32, 6  ;;  %v1431_v17 = vperm.slane %v1778_v32, 7 }
 0x799   :  { %1344 = vmatpush.msrb.mxu2 %v1699_v35 }
 0x79a   :  { %1633 = vmatmul.msk.f32.vlgmr.msrb.gmra.mxu2 %vm268_vm15, %v1301_v36 }
 0x7a2   :  { %1634 = vmatmul.msk.f32.gmra.mxu2 %vm268_vm15, %v1316_v3 }
 0x7ef   :  { %v968_v42 = vpop.f32.mrf.mxu3 }
 0x7f7   :  { %v971_v44 = vpop.f32.mrf.mxu3 }
 0x7fa   :  { %v1094_v46 = vpop.f32.mrf.mxu2 }
 0x7fb   :  { %1354 = vrot.lane.b32.xlu0 %v1094_v46, %s1833_s18 }
 0x800   :  { %v1220_v41 = vpop.f32.mrf.mxu3 }
 0x801   :  { %1362 = vrot.lane.b32.xlu2 %v1220_v41, %s1848_s8 }
 0x802   :  { %v1097_v13 = vpop.f32.mrf.mxu2 }
 0x809   :  { %1356 = vrot.lane.b32.xlu2 %v1097_v13, %s1833_s18 }
 0x80b   :  { %v1223_v25 = vpop.f32.mrf.mxu3 }
 0x81d   :  { %v1346_v49 = vpop.f32.mrf.mxu2 }
 0x81e   :  { %1370 = vrot.lane.b32.xlu0 %v1346_v49, %s1849_s9 }
 0x825   :  { %v1349_v50 = vpop.f32.mrf.mxu2 }
 0x826   :  { %1364 = vrot.lane.b32.xlu0 %v1223_v25, %s1848_s8  ;;  %1372 = vrot.lane.b32.xlu2 %v1349_v50, %s1849_s9 }
 0x85b   :  { %v1363_v48 = vpop.permute.xlu2 %1362 }
 0x863   :  { %v1357_v57 = vpop.permute.xlu2 %1356 }
 0x864   :  { %v1377_v59 = vsel %vm80_vm1, %v971_v44, %v1357_v57 }
 0x86d   :  { %v1355_v52 = vpop.permute.xlu0 %1354 }
 0x86e   :  { %v1376_v54 = vsel %vm80_vm1, %v968_v42, %v1355_v52  ;;  %v45_v52 = vld [vmem:[#allocation2 + $0x70] sm:$0xff] }
 0x86f   :  { %v1378_v55 = vsel %vm268_vm15, %v1376_v54, %v1363_v48  ;;  %1487 = vmatpush.msrb.mxu3 %v45_v52  ;;  %v44_v54 = vld [vmem:[#allocation2 + $0x68] sm:$0xff] }
 0x871   :  { %1488 = vmatpush.msrb.mxu3 %v44_v54 }
 0x880   :  { %v1373_v23 = vpop.permute.xlu2 %1372 }
 0x890   :  { %v1371_v56 = vpop.permute.xlu0 %1370 }
 0x891   :  { %v1380_v28 = vsel %vm758_vm10, %v1378_v55, %v1371_v56  ;;  %v43_v55 = vld [vmem:[#allocation2 + $0x60] sm:$0xff]  ;;  %v1434_v56 = vperm.slane %v1778_v32, 2 }
 0x892   :  { %v1382_v58 = vadd.f32 %v1380_v28, %v2124_v8  ;;  %1489 = vmatpush.msrb.mxu3 %v43_v55 }
 0x894   :  { %v1384_v43 = vsel %vm197_vm3, %v1382_v58, 0.0 }
 0x895   :  { %1385 = vadd.xlane.f32.xlu1 %v1384_v43 }
 0x898   :  { %v1365_v61 = vpop.permute.xlu0 %1364 }
 0x899   :  { %v1379_v53 = vsel %vm268_vm15, %v1377_v59, %v1365_v61 }
 0x89a   :  { %v1381_v20 = vsel %vm758_vm10, %v1379_v53, %v1373_v23  ;;  %v1466_v23 = vperm.slane %v1778_v32, 3 }
 0x89b   :  { %v1383_v63 = vadd.f32 %v1381_v20, %v2128_v16  ;;  %v42_v16 = vld [vmem:[#allocation2 + $0x58] sm:$0xff] }
 0x89c   :  { %1453 = vmatpush.msrb.mxu1 %v42_v16 }
 0x89d   :  { %v1387_v0 = vsel %vm197_vm3, %v1383_v63, 0.0 }
 0x89e   :  { %1388 = vadd.xlane.f32.xlu0 %v1387_v0  ;;  %1454 = vmatpush.msrb.mxu1 %v41_v7 }
 0x8a0   :  { %1455 = vmatpush.msrb.mxu1 %v40_v39 }
 0x8a2   :  { %1456 = vmatpush.msrb.mxu1 %v39_v11 }
 0x908   :  { %v1386_v1 = vpop.xlane.xlu1 %1385 }
 0x909   :  { %v1390_v2 = vmul.f32 %v1386_v1, %v2114_v38 }
 0x90b   :  { %v1392_v8 = vsub.f32 %v1382_v58, %v1390_v2 }
 0x90d   :  { %v1394_v4 = vmul.f32 %v1392_v8, %v1392_v8  ;;  %v1405_v22 = vmul.f32 %v1404_v33, %v1392_v8 }
 0x90f   :  { %v1396_v5 = vsel %vm197_vm3, %v1394_v4, 0.0 }
 0x910   :  { %1397 = vadd.xlane.f32.xlu2 %v1396_v5 }
 0x911   :  { %v1389_v47 = vpop.xlane.xlu0 %1388 }
 0x912   :  { %v1391_v6 = vmul.f32 %v1389_v47, %v2114_v38 }
 0x914   :  { %v1393_v60 = vsub.f32 %v1383_v63, %v1391_v6 }
 0x916   :  { %v1395_v9 = vmul.f32 %v1393_v60, %v1393_v60  ;;  %v1406_v49 = vmul.f32 %v1404_v33, %v1393_v60 }
 0x918   :  { %v1399_v10 = vsel %vm197_vm3, %v1395_v9, 0.0 }
 0x919   :  { %1400 = vadd.xlane.f32.xlu1 %v1399_v10 }
 0x983   :  { %v1398_v14 = vpop.xlane.xlu2 %1397 }
 0x984   :  { %v1402_v12 = vmul.f32 %v1398_v14, %v2114_v38 }
 0x986   :  { %v1407_v51 = vadd.f32 1e-05, %v1402_v12 }
 0x988   :  { %1770 = vrsqrt.f32 %v1407_v51  ;;  %vm1415_vm15 = vweird.f32 %v1407_v51 }
 0x98c   :  { %v1401_v24 = vpop.xlane.xlu1 %1400 }
 0x98d   :  { %v1403_v26 = vmul.f32 %v1401_v24, %v2114_v38 }
 0x98e   :  { %v1771_v15 = vpop.eup %1770 }
 0x98f   :  { %v1410_v29 = vmul.f32 %v1771_v15, %v1407_v51  ;;  %v1408_v30 = vadd.f32 1e-05, %v1403_v26  ;;  %vm1416_vm1 = vweird.f32 %v1771_v15  ;;  %v52_v26 = vld [vmem:[#allocation2 + $0xa8] sm:$0xff] }
 0x990   :  { %vm1417_vm10 = vmor %vm1415_vm15, %vm1416_vm1  ;;  %v1546_v32 = vperm.slane %v52_v26, 1 }
 0x991   :  { %v1411_v45 = vmul.f32 %v1771_v15, %v1410_v29  ;;  %1772 = vrsqrt.f32 %v1408_v30  ;;  %vm1425_vm0 = vweird.f32 %v1408_v30  ;;  %v1519_v29 = vperm.slane %v52_v26, 0 }
 0x993   :  { %v1412_v31 = vmul.f32 0.5, %v1411_v45 }
 0x995   :  { %v1413_v34 = vsub.f32 1.5, %v1412_v31 }
 0x997   :  { %v1773_v35 = vpop.eup %1772  ;;  %v1414_v36 = vmul.f32 %v1771_v15, %v1413_v34 }
 0x998   :  { %v1420_v40 = vmul.f32 %v1773_v35, %v1408_v30  ;;  %vm1426_vm14 = vweird.f32 %v1773_v35 }
 0x999   :  { %v1418_v37 = vsel %vm1417_vm10, %v1771_v15, %v1414_v36  ;;  %vm1427_vm2 = vmor %vm1425_vm0, %vm1426_vm14 }
 0x99a   :  { %v1429_v3 = vmul.f32 %v1418_v37, %v1405_v22  ;;  %v1421_v42 = vmul.f32 %v1773_v35, %v1420_v40 }
 0x99c   :  { %v1432_v44 = vadd.f32 %v1431_v17, %v1429_v3  ;;  %v1422_v46 = vmul.f32 0.5, %v1421_v42 }
 0x99e   :  { %v1423_v41 = vsub.f32 1.5, %v1422_v46  ;;  %1635 = vmatmul.msk.f32.vlgmr.msrb.gmra.mxu1 %vm197_vm3, %v1432_v44 }
 0x9a0   :  { %v1424_v13 = vmul.f32 %v1773_v35, %v1423_v41 }
 0x9a2   :  { %v1428_v25 = vsel %vm1427_vm2, %v1773_v35, %v1424_v13 }
 0x9a3   :  { %v1430_v50 = vmul.f32 %v1428_v25, %v1406_v49 }
 0x9a5   :  { %v1433_v48 = vadd.f32 %v1431_v17, %v1430_v50 }
 0x9a7   :  { %1636 = vmatmul.msk.f32.gmra.mxu1 %vm197_vm3, %v1433_v48 }
 0xa1b   :  { %v1458_v57 = vpop.f32.mrf.mxu1 }
 0xa1c   :  { %v1459_v28 = vadd.f32 %v1458_v57, %v1434_v56 }
 0xa1e   :  { %v1464_v58 = vmax.f32 %v1459_v28, 0.0 }
 0xa20   :  { %1637 = vmatmul.msk.f32.vlgmr.msrb.gmra.mxu3 %vm1467_vm4, %v1464_v58 }
 0xa24   :  { %v1461_v43 = vpop.f32.mrf.mxu1 }
 0xa25   :  { %v1462_v59 = vadd.f32 %v1461_v43, %v1434_v56 }
 0xa27   :  { %v1465_v61 = vmax.f32 %v1462_v59, 0.0 }
 0xa29   :  { %1638 = vmatmul.msk.f32.gmra.mxu3 %vm1467_vm4, %v1465_v61 }
 0xaa3   :  { %v1491_v53 = vpop.f32.mrf.mxu3 }
 0xaa4   :  { %v1492_v20 = vadd.f32 %v1491_v53, %v1466_v23 }
 0xaa6   :  { %v1497_v63 = vadd.f32 %v1492_v20, %v1432_v44 }
 0xaa8   :  { %v1499_v0 = vsel %vm197_vm3, %v1497_v63, 0.0 }
 0xaa9   :  { %1500 = vadd.xlane.f32.xlu0 %v1499_v0 }
 0xaac   :  { %v1494_v1 = vpop.f32.mrf.mxu3 }
 0xaad   :  { %v1495_v2 = vadd.f32 %v1494_v1, %v1466_v23 }
 0xaaf   :  { %v1498_v8 = vadd.f32 %v1495_v2, %v1433_v48 }
 0xab1   :  { %v1502_v4 = vsel %vm197_vm3, %v1498_v8, 0.0 }
 0xab2   :  { %1503 = vadd.xlane.f32.xlu2 %v1502_v4 }
 0xb1c   :  { %v1501_v5 = vpop.xlane.xlu0 %1500 }
 0xb1d   :  { %v1505_v47 = vmul.f32 %v1501_v5, %v2114_v38 }
 0xb1f   :  { %v1507_v6 = vsub.f32 %v1497_v63, %v1505_v47 }
 0xb21   :  { %v1509_v60 = vmul.f32 %v1507_v6, %v1507_v6  ;;  %v1520_v33 = vmul.f32 %v1519_v29, %v1507_v6 }
 0xb23   :  { %v1511_v9 = vsel %vm197_vm3, %v1509_v60, 0.0 }
 0xb24   :  { %1512 = vadd.xlane.f32.xlu1 %v1511_v9 }
 0xb25   :  { %v1504_v10 = vpop.xlane.xlu2 %1503 }
 0xb26   :  { %v1506_v16 = vmul.f32 %v1504_v10, %v2114_v38 }
 0xb28   :  { %v1508_v7 = vsub.f32 %v1498_v8, %v1506_v16 }
 0xb2a   :  { %v1510_v39 = vmul.f32 %v1508_v7, %v1508_v7  ;;  %v1521_v3 = vmul.f32 %v1519_v29, %v1508_v7 }
 0xb2c   :  { %v1514_v11 = vsel %vm197_vm3, %v1510_v39, 0.0 }
 0xb2d   :  { %1515 = vadd.xlane.f32.xlu0 %v1514_v11 }
 0xb97   :  { %v1513_v14 = vpop.xlane.xlu1 %1512 }
 0xb98   :  { %v1517_v12 = vmul.f32 %v1513_v14, %v2114_v38 }
 0xb9a   :  { %v1522_v51 = vadd.f32 1e-05, %v1517_v12 }
 0xb9c   :  { %1774 = vrsqrt.f32 %v1522_v51  ;;  %vm1530_vm6 = vweird.f32 %v1522_v51 }
 0xba0   :  { %v1516_v18 = vpop.xlane.xlu0 %1515 }
 0xba1   :  { %v1518_v19 = vmul.f32 %v1516_v18, %v2114_v38 }
 0xba2   :  { %v1775_v21 = vpop.eup %1774 }
 0xba3   :  { %v1525_v62 = vmul.f32 %v1775_v21, %v1522_v51  ;;  %v1523_v24 = vadd.f32 1e-05, %v1518_v19  ;;  %vm1531_vm5 = vweird.f32 %v1775_v21 }
 0xba4   :  { %vm1532_vm7 = vmor %vm1530_vm6, %vm1531_vm5 }
 0xba5   :  { %v1526_v27 = vmul.f32 %v1775_v21, %v1525_v62  ;;  %1776 = vrsqrt.f32 %v1523_v24  ;;  %vm1540_vm9 = vweird.f32 %v1523_v24 }
 0xba7   :  { %v1527_v15 = vmul.f32 0.5, %v1526_v27 }
 0xba9   :  { %v1528_v30 = vsub.f32 1.5, %v1527_v15 }
 0xbab   :  { %v1777_v45 = vpop.eup %1776  ;;  %v1529_v31 = vmul.f32 %v1775_v21, %v1528_v30 }
 0xbac   :  { %v1535_v34 = vmul.f32 %v1777_v45, %v1523_v24  ;;  %vm1541_vm8 = vweird.f32 %v1777_v45 }
 0xbad   :  { %v1533_v35 = vsel %vm1532_vm7, %v1775_v21, %v1529_v31  ;;  %vm1542_vm11 = vmor %vm1540_vm9, %vm1541_vm8 }
 0xbae   :  { %v1544_v36 = vmul.f32 %v1533_v35, %v1520_v33  ;;  %v1536_v38 = vmul.f32 %v1777_v45, %v1535_v34 }
 0xbb0   :  { %v1537_v22 = vmul.f32 0.5, %v1536_v38  ;;  %v1547_v17 = vadd.f32 %v1546_v32, %v1544_v36 }
 0xbb2   :  { %v1538_v40 = vsub.f32 1.5, %v1537_v22  ;;  %1549 = vst.msk [vmem:[#allocation5] sm:$0xff] %vm197_vm3, %v1547_v17 }
 0xbb4   :  { %v1539_v37 = vmul.f32 %v1777_v45, %v1538_v40 }
 0xbb6   :  { %v1543_v42 = vsel %vm1542_vm11, %v1777_v45, %v1539_v37 }
 0xbb7   :  { %v1545_v44 = vmul.f32 %v1543_v42, %v1521_v3 }
 0xbb9   :  { %v1548_v46 = vadd.f32 %v1546_v32, %v1545_v44 }
 0xbbb   :  { %1550 = vst.msk [vmem:[#allocation5 + $0x8] sm:$0xff] %vm197_vm3, %v1548_v46 }
 0xbbc   :  { %1563 = dma.vmem_to_hbm [thread:$0]  %s1556_s11, 256, %s1558_s14, [#allocation4], %s1832_s17, %s1832_s17, %s1833_s18  }
 0xbbd   :  { %1829 = dma.done.wait [#allocation4], 256  }
 0xbbe   :  { %1830 = vsyncadd [#allocation4], 4294967040 }
 0xbbf   :  { %1568 = vsyncpa [#allocation3], 1 }
 0xbc0   :  { %1569 = vsyncpa [#allocation4], 1 }

</bundles_post_ra>
